<compile_context>
chip_gen: v6e
topology: v6e:2x2x1
jax: 0.10.0
libtpu: 0.0.40
codegen_flags: <defaults>
</compile_context>

<pallas_src>
import math

import jax
import jax.numpy as jnp
from jax.experimental import pallas as pl
from jax.experimental.pallas import tpu as pltpu

_LN_EPS = 1e-5  # PyTorch nn.LayerNorm default


def _round_up(x, m):
    return (x + m - 1) // m * m


def _pick_batch_tile(batch, max_tile):
    """Largest divisor of `batch` <= max_tile, preferring >= 2 grid steps (v7x has 2 TCs)."""
    divisors = [d for d in range(1, batch + 1) if batch % d == 0 and d <= max_tile]
    multi = [d for d in divisors if batch // d >= 2]
    return max(multi) if multi else max(divisors)


# ---------------------------------------------------------------------------
# Kernel 1: LayerNorm(q,k,v) + MultiheadAttention + folded(out_proj@proj)
#           + residual + LayerNorm
# ---------------------------------------------------------------------------
def _cross_attn_block_kernel(
    q_ref, kv_ref,
    gq_ref, bgq_ref, gk_ref, bgk_ref, gv_ref, bgv_ref,
    wq_ref, bq_ref, wk_ref, bk_ref, wv_ref, bv_ref,
    wop_ref, bop_ref, gn_ref, bgn_ref,
    feat_ref, attnw_ref):
    eps = jnp.float32(_LN_EPS)

    def layernorm(x, g, b):
        mu = jnp.mean(x, axis=-1, keepdims=True)
        var = jnp.mean(jnp.square(x - mu), axis=-1, keepdims=True)
        return (x - mu) * jax.lax.rsqrt(var + eps) * g + b

    tb, q_len, dim = q_ref.shape
    k_len = kv_ref.shape[1]
    num_heads = attnw_ref.shape[1]
    hd = dim // num_heads
    scale = jnp.float32(1.0 / math.sqrt(hd))
    # Feed MXU operands in the stored weight dtype (bf16 weights stay bf16,
    # f32 weights stay f32); f32 only for elementwise math + accumulators.
    mxu_dtype = wq_ref.dtype

    q_in = q_ref[...].astype(jnp.float32).reshape(tb * q_len, dim)
    kv_in = kv_ref[...].astype(jnp.float32).reshape(tb * k_len, dim)

    qn = layernorm(q_in, gq_ref[...], bgq_ref[...])
    kn = layernorm(kv_in, gk_ref[...], bgk_ref[...])
    vn = layernorm(kv_in, gv_ref[...], bgv_ref[...])

    # Full-width projections: ONE (rows, D) @ (D, D) MXU pass per tensor.
    qp = (jnp.dot(qn.astype(mxu_dtype), wq_ref[...],
                  preferred_element_type=jnp.float32)
          + bq_ref[...]).reshape(tb, q_len, dim)
    kp = (jnp.dot(kn.astype(mxu_dtype), wk_ref[...],
                  preferred_element_type=jnp.float32)
          + bk_ref[...]).reshape(tb, k_len, dim)
    vp = (jnp.dot(vn.astype(mxu_dtype), wv_ref[...],
                  preferred_element_type=jnp.float32)
          + bv_ref[...]).reshape(tb, k_len, dim)

    # Per-head attention core (only the small (q_len, k_len, hd)-sized math),
    # batched over the tb batch tile.  Statically unrolled.
    ctx_parts = []
    for h in range(num_heads):
        sl = slice(h * hd, (h + 1) * hd)
        qh = qp[:, :, sl].astype(mxu_dtype)
        kh = kp[:, :, sl].astype(mxu_dtype)
        vh = vp[:, :, sl].astype(mxu_dtype)
        s = jnp.einsum("bqe,bke->bqk", qh, kh,
                       preferred_element_type=jnp.float32) * scale
        s = s - jnp.max(s, axis=-1, keepdims=True)
        e = jnp.exp(s)
        # softmax normalization on the EUP reciprocal slot (frees VALU slots)
        p = e * pl.reciprocal(jnp.sum(e, axis=-1, keepdims=True), approx=True)
        attnw_ref[:, h, :, :] = p.astype(attnw_ref.dtype)   # need_weights output
        # attn dropout -> identity (eval mode)
        ctx_parts.append(jnp.einsum("bqk,bke->bqe", p.astype(mxu_dtype), vh,
                                    preferred_element_type=jnp.float32))
    ctx = jnp.concatenate(ctx_parts, axis=-1).reshape(tb * q_len, dim)

    # Single folded projection: W = wo @ wp, b = bo @ wp + bp (host-side fold).
    proj_out = jnp.dot(ctx.astype(mxu_dtype), wop_ref[...],
                       preferred_element_type=jnp.float32) + bop_ref[...]
    # proj dropout -> identity (eval mode); residual + Local_Refiner.norm
    feat = layernorm(proj_out + q_in, gn_ref[...], bgn_ref[...])
    feat_ref[...] = feat.reshape(tb, q_len, dim).astype(feat_ref.dtype)


def cross_attention_block_pallas(local_tokens, w2v, params, num_heads, *, batch_tile=8):
    B, q_len, dim = local_tokens.shape
    k_len = w2v.shape[1]
    assert dim % num_heads == 0

    tb = _pick_batch_tile(B, batch_tile)
    grid = (B // tb,)

    f32 = jnp.float32
    hi = jax.lax.Precision.HIGHEST

    wq, bq = params["wq"], params["bq"].reshape(1, dim)
    wk, bk = params["wk"], params["bk"].reshape(1, dim)
    wv, bv = params["wv"], params["bv"].reshape(1, dim)
    # Fold attn.out_proj and CrossAttention.proj (no nonlinearity between them):
    #   (ctx @ wo + bo) @ wp + bp == ctx @ (wo @ wp) + (bo @ wp + bp)
    w_op = jnp.dot(params["wo"].astype(f32), params["wp"].astype(f32),
                   precision=hi).astype(params["wo"].dtype)
    b_op = (jnp.dot(params["bo"].reshape(1, dim).astype(f32),
                    params["wp"].astype(f32), precision=hi)
            + params["bp"].reshape(1, dim).astype(f32))

    gq, bgq = params["ln_q"][0].reshape(1, dim), params["ln_q"][1].reshape(1, dim)
    gk, bgk = params["ln_k"][0].reshape(1, dim), params["ln_k"][1].reshape(1, dim)
    gv, bgv = params["ln_v"][0].reshape(1, dim), params["ln_v"][1].reshape(1, dim)
    gn, bgn = params["ln_out"][0].reshape(1, dim), params["ln_out"][1].reshape(1, dim)

    def batch3(b):
        return (b, 0, 0)

    def fix2(b):
        return (0, 0)

    vec = pl.BlockSpec((1, dim), fix2)
    mat = pl.BlockSpec((dim, dim), fix2)

    in_specs = [
        pl.BlockSpec((tb, q_len, dim), batch3),     # local_tokens (q + residual)
        pl.BlockSpec((tb, k_len, dim), batch3),     # w2v (shared K/V source, passed once)
        vec, vec, vec, vec, vec, vec,               # norm_q / norm_k / norm_v (gain, bias)
        mat, vec, mat, vec, mat, vec,               # wq/bq, wk/bk, wv/bv (full-width)
        mat, vec,                                   # folded out_proj @ proj
        vec, vec,                                   # Local_Refiner.norm
    ]
    out_specs = [
        pl.BlockSpec((tb, q_len, dim), batch3),
        pl.BlockSpec((tb, num_heads, q_len, k_len), lambda b: (b, 0, 0, 0)),
    ]
    out_shape = (
        jax.ShapeDtypeStruct((B, q_len, dim), local_tokens.dtype),
        jax.ShapeDtypeStruct((B, num_heads, q_len, k_len), jnp.float32),
    )

    # VMEM budget: double-buffered activation tiles + weights + f32
    # intermediates; floor 16 MiB (covers v5e's default scoped limit at
    # dim=768), cap 48 MiB (headroom under v7x's 64 MiB physical VMEM).
    in_isz = jnp.dtype(local_tokens.dtype).itemsize
    w_isz = jnp.dtype(wq.dtype).itemsize
    vmem_est = (
        2 * in_isz * tb * (q_len + k_len) * dim
        + 2 * (in_isz * tb * q_len * dim + 4 * tb * num_heads * q_len * k_len)
        + 2 * w_isz * 4 * dim * dim
        + 2 * 4 * 12 * dim
        + 4 * tb * (4 * q_len + 3 * k_len) * dim)
    vmem_limit = int(min(max(int(1.5 * vmem_est), 16 * 1024 * 1024),
                         48 * 1024 * 1024))

    local_feat, attn_w = pl.pallas_call(
        _cross_attn_block_kernel,
        out_shape=out_shape,
        grid_spec=pltpu.PrefetchScalarGridSpec(
            num_scalar_prefetch=0,
            grid=grid,
            in_specs=in_specs,
            out_specs=out_specs,
        ),
        compiler_params=pltpu.CompilerParams(
            dimension_semantics=("parallel",),     # batch-tile axis splits across TCs (v7x)
            vmem_limit_bytes=vmem_limit),
    )(local_tokens, w2v,
      gq, bgq, gk, bgk, gv, bgv,
      wq, bq, wk, bk, wv, bv,
      w_op, b_op, gn, bgn)
    return local_feat, attn_w


# ---------------------------------------------------------------------------
# Kernel 2: MLP (fc1 -> GELU -> fc2) fused with residual add
# ---------------------------------------------------------------------------
def _mlp_residual_kernel(x_ref, w1_ref, b1_ref, w2_ref, b2_ref, o_ref):
    x = x_ref[...]                                   # (TM, dim), stored dtype
    # fc1 — MXU operands in the stored weight dtype; accumulate in f32.
    h = jnp.dot(x.astype(w1_ref.dtype), w1_ref[...],
                preferred_element_type=jnp.float32) + b1_ref[...]
    # exact GELU (erf), f32 elementwise math (matches nn.GELU default)
    h = 0.5 * h * (1.0 + jax.lax.erf(h * jnp.float32(1.0 / math.sqrt(2.0))))
    # dropout -> identity (eval mode)
    y = jnp.dot(h.astype(w2_ref.dtype), w2_ref[...],
                preferred_element_type=jnp.float32) + b2_ref[...]
    # dropout -> identity; fused residual (refined = mlp(x) + x)
    o_ref[...] = (y + x.astype(jnp.float32)).astype(o_ref.dtype)


def mlp_residual_pallas(x, w1, b1, w2, b2, *, tile_m=256):
    """Computes fc2(gelu(fc1(x))) + x over all leading dims flattened into rows."""
    orig_shape = x.shape
    dim = orig_shape[-1]
    hidden = w1.shape[1]
    assert w1.shape == (dim, hidden) and w2.shape == (hidden, dim)

    x2d = x.reshape(-1, dim)
    n = x2d.shape[0]

    # Only a tiny (<8 row) pad for sublane alignment; tile_m-level raggedness is
    # handled by the cdiv grid's masked boundary block.  NOTE: that boundary
    # block reads past-the-end rows of x for the residual; those rows are
    # discarded on write, so the result is correct (erf on garbage is bounded).
    n_al = _round_up(n, 8)
    if n_al != n:
        x2d = jnp.pad(x2d, ((0, n_al - n), (0, 0)))

    # Large lane-dense row tile for MXU utilization, clamped to available rows.
    tile_m = max(8, min(_round_up(tile_m, 8), n_al))
    if n_al >= 16:
        # Keep >= 2 steps on the "parallel" axis so v7x's second TensorCore has
        # work (costs one extra ~0.35 us step on 1-TC v5e/v6e — negligible).
        tile_m = min(tile_m, _round_up(pl.cdiv(n_al, 2), 8))
    grid = (pl.cdiv(n_al, tile_m),)

    b1_2d = b1.reshape(1, hidden)
    b2_2d = b2.reshape(1, dim)

    # VMEM budget: double-buffered in/out tiles + resident weights + f32
    # intermediates; cap at 48 MiB (headroom under v7x's 64 MiB physical VMEM).
    itemsize = max(jnp.dtype(x.dtype).itemsize, 4)
    vmem_est = itemsize * (
        4 * tile_m * dim
        + 2 * dim * hidden + 2 * hidden * dim
        + 2 * (hidden + dim)
        + tile_m * hidden + 2 * tile_m * dim)
    vmem_limit = int(min(max(2 * vmem_est, 8 * 1024 * 1024), 48 * 1024 * 1024))

    out2d = pl.pallas_call(
        _mlp_residual_kernel,
        out_shape=jax.ShapeDtypeStruct((n_al, dim), x.dtype),
        grid_spec=pltpu.PrefetchScalarGridSpec(
            num_scalar_prefetch=0,
            grid=grid,
            in_specs=[
                pl.BlockSpec((tile_m, dim), lambda i: (i, 0)),   # x tile
                pl.BlockSpec((dim, hidden), lambda i: (0, 0)),   # w1 (resident)
                pl.BlockSpec((1, hidden), lambda i: (0, 0)),     # b1
                pl.BlockSpec((hidden, dim), lambda i: (0, 0)),   # w2 (resident)
                pl.BlockSpec((1, dim), lambda i: (0, 0)),        # b2
            ],
            out_specs=pl.BlockSpec((tile_m, dim), lambda i: (i, 0)),
        ),
        compiler_params=pltpu.CompilerParams(
            dimension_semantics=("parallel",),
            vmem_limit_bytes=vmem_limit),
    )(x2d, w1, b1_2d, w2, b2_2d)

    if n_al != n:
        out2d = out2d[:n]
    return out2d.reshape(orig_shape)


# ---------------------------------------------------------------------------
# Full Local_Refiner forward
# ---------------------------------------------------------------------------
def local_refiner_pallas(local_tokens, w2v, params, *, num_heads=8, tile_m=256,
                         batch_tile=8):
    local_feat, attn_w = cross_attention_block_pallas(
        local_tokens, w2v, params, num_heads, batch_tile=batch_tile)
    refined_feat = mlp_residual_pallas(local_feat, params["w1"], params["b1"],
                                       params["w2"], params["b2"], tile_m=tile_m)
    return refined_feat, attn_w


# ---------------------------------------------------------------------------
# Deterministic parameter init (weights stored transposed: (in, out))
# ---------------------------------------------------------------------------
def init_local_refiner_params(key, dim, num_heads=8, mlp_ratio=2, dtype=jnp.float32):
    hidden = dim * mlp_ratio
    keys = iter(jax.random.split(key, 22))

    def linear(fan_in, fan_out):
        bound = 1.0 / math.sqrt(fan_in)
        w = jax.random.uniform(next(keys), (fan_in, fan_out), dtype, -bound, bound)
        b = jax.random.uniform(next(keys), (fan_out,), dtype, -bound, bound)
        return w, b

    def layernorm_params():
        g = 1.0 + 0.1 * jax.random.normal(next(keys), (dim,), dtype)
        b = 0.1 * jax.random.normal(next(keys), (dim,), dtype)
        return g, b

    params = {}
    params["ln_q"] = layernorm_params()
    params["ln_k"] = layernorm_params()
    params["ln_v"] = layernorm_params()
    params["wq"], params["bq"] = linear(dim, dim)
    params["wk"], params["bk"] = linear(dim, dim)
    params["wv"], params["bv"] = linear(dim, dim)
    params["wo"], params["bo"] = linear(dim, dim)   # attn out_proj
    params["wp"], params["bp"] = linear(dim, dim)   # CrossAttention.proj
    params["ln_out"] = layernorm_params()           # Local_Refiner.norm
    params["w1"], params["b1"] = linear(dim, hidden)
    params["w2"], params["b2"] = linear(hidden, dim)
    return params


# ---------------------------------------------------------------------------
# Pure-JAX reference for the full forward
# ---------------------------------------------------------------------------
def local_refiner_reference(local_tokens, w2v, params, num_heads):
    P = jax.lax.Precision.HIGHEST

    def ln(x, gb):
        g, b = gb
        mu = jnp.mean(x, axis=-1, keepdims=True)
        var = jnp.mean(jnp.square(x - mu), axis=-1, keepdims=True)
        return (x - mu) * jax.lax.rsqrt(var + _LN_EPS) * g + b

    B, q_len, dim = local_tokens.shape
    k_len = w2v.shape[1]
    hd = dim // num_heads

    qn = ln(local_tokens, params["ln_q"])
    kn = ln(w2v, params["ln_k"])
    vn = ln(w2v, params["ln_v"])

    qp = jnp.einsum("bqd,de->bqe", qn, params["wq"], precision=P) + params["bq"]
    kp = jnp.einsum("bkd,de->bke", kn, params["wk"], precision=P) + params["bk"]
    vp = jnp.einsum("bkd,de->bke", vn, params["wv"], precision=P) + params["bv"]

    qh = qp.reshape(B, q_len, num_heads, hd).transpose(0, 2, 1, 3)
    kh = kp.reshape(B, k_len, num_heads, hd).transpose(0, 2, 1, 3)
    vh = vp.reshape(B, k_len, num_heads, hd).transpose(0, 2, 1, 3)

    scores = jnp.einsum("bhqe,bhke->bhqk", qh, kh, precision=P) / math.sqrt(hd)
    attn = jax.nn.softmax(scores, axis=-1)
    ctx = jnp.einsum("bhqk,bhke->bhqe", attn, vh, precision=P)
    ctx = ctx.transpose(0, 2, 1, 3).reshape(B, q_len, dim)

    attn_out = jnp.einsum("bqd,de->bqe", ctx, params["wo"], precision=P) + params["bo"]
    proj_out = jnp.einsum("bqd,de->bqe", attn_out, params["wp"], precision=P) + params["bp"]

    local_feat = ln(proj_out + local_tokens, params["ln_out"])

    h = jnp.einsum("bqd,dh->bqh", local_feat, params["w1"], precision=P) + params["b1"]
    h = 0.5 * h * (1.0 + jax.lax.erf(h / math.sqrt(2.0)))
    mlp_out = jnp.einsum("bqh,hd->bqd", h, params["w2"], precision=P) + params["b2"]
    return mlp_out + local_feat, attn


if __name__ == "__main__":
    # Small shapes consistent with the module: dim multiple of 128 (lane dense)
    # and divisible by num_heads=8; attr_num plays the role of the query length.
    dim = 128
    num_heads = 8
    mlp_ratio = 2
    batch, attr_num, k_len = 2, 8, 8

    key = jax.random.PRNGKey(0)
    kq, kk, kp = jax.random.split(key, 3)
    local_tokens = jax.random.normal(kq, (batch, attr_num, dim), dtype=jnp.float32)
    w2v = jax.random.normal(kk, (batch, k_len, dim), dtype=jnp.float32)
    params = init_local_refiner_params(kp, dim, num_heads, mlp_ratio)

    refined_feat, attn_w = local_refiner_pallas(local_tokens, w2v, params,
                                                num_heads=num_heads, tile_m=256)
    refined_feat = jax.block_until_ready(refined_feat)
    attn_w = jax.block_until_ready(attn_w)

    ref_feat, ref_attn = local_refiner_reference(local_tokens, w2v, params, num_heads)

    assert refined_feat.shape == local_tokens.shape
    assert attn_w.shape == (batch, num_heads, attr_num, k_len)
    assert jnp.allclose(refined_feat, ref_feat, atol=5e-3, rtol=5e-3), "refined_feat mismatch"
    assert jnp.allclose(attn_w, ref_attn, atol=5e-3, rtol=5e-3), "attn_weights mismatch"

    print("KERNEL_OK")
</pallas_src>

<mosaic_0001>
module attributes {stable_mosaic.version = 11 : i64} {
  func.func @_cross_attn_block_kernel(%arg0: i32, %arg1: memref<1x8x128xf32, #tpu.memory_space<vmem>>, %arg2: memref<1x8x128xf32, #tpu.memory_space<vmem>>, %arg3: memref<1x128xf32, #tpu.memory_space<vmem>>, %arg4: memref<1x128xf32, #tpu.memory_space<vmem>>, %arg5: memref<1x128xf32, #tpu.memory_space<vmem>>, %arg6: memref<1x128xf32, #tpu.memory_space<vmem>>, %arg7: memref<1x128xf32, #tpu.memory_space<vmem>>, %arg8: memref<1x128xf32, #tpu.memory_space<vmem>>, %arg9: memref<128x128xf32, #tpu.memory_space<vmem>>, %arg10: memref<1x128xf32, #tpu.memory_space<vmem>>, %arg11: memref<128x128xf32, #tpu.memory_space<vmem>>, %arg12: memref<1x128xf32, #tpu.memory_space<vmem>>, %arg13: memref<128x128xf32, #tpu.memory_space<vmem>>, %arg14: memref<1x128xf32, #tpu.memory_space<vmem>>, %arg15: memref<128x128xf32, #tpu.memory_space<vmem>>, %arg16: memref<1x128xf32, #tpu.memory_space<vmem>>, %arg17: memref<1x128xf32, #tpu.memory_space<vmem>>, %arg18: memref<1x128xf32, #tpu.memory_space<vmem>>, %arg19: memref<1x8x128xf32, #tpu.memory_space<vmem>>, %arg20: memref<1x8x8x8xf32, #tpu.memory_space<vmem>>) attributes {dimension_semantics = [#tpu.dimension_semantics<parallel>], iteration_bounds = array<i64: 2>, scalar_prefetch = 0 : i64, scratch_operands = 0 : i64, tpu.core_type = #tpu.core_type<tc>, window_params = [{transform_indices = @transform_0, window_bounds = array<i64: 1, 8, 128>}, {transform_indices = @transform_1, window_bounds = array<i64: 1, 8, 128>}, {pipeline_mode = #tpu.pipeline_mode<synchronous>, transform_indices = @transform_2, window_bounds = array<i64: 1, 128>}, {pipeline_mode = #tpu.pipeline_mode<synchronous>, transform_indices = @transform_3, window_bounds = array<i64: 1, 128>}, {pipeline_mode = #tpu.pipeline_mode<synchronous>, transform_indices = @transform_4, window_bounds = array<i64: 1, 128>}, {pipeline_mode = #tpu.pipeline_mode<synchronous>, transform_indices = @transform_5, window_bounds = array<i64: 1, 128>}, {pipeline_mode = #tpu.pipeline_mode<synchronous>, transform_indices = @transform_6, window_bounds = array<i64: 1, 128>}, {pipeline_mode = #tpu.pipeline_mode<synchronous>, transform_indices = @transform_7, window_bounds = array<i64: 1, 128>}, {pipeline_mode = #tpu.pipeline_mode<synchronous>, transform_indices = @transform_8, window_bounds = array<i64: 128, 128>}, {pipeline_mode = #tpu.pipeline_mode<synchronous>, transform_indices = @transform_9, window_bounds = array<i64: 1, 128>}, {pipeline_mode = #tpu.pipeline_mode<synchronous>, transform_indices = @transform_10, window_bounds = array<i64: 128, 128>}, {pipeline_mode = #tpu.pipeline_mode<synchronous>, transform_indices = @transform_11, window_bounds = array<i64: 1, 128>}, {pipeline_mode = #tpu.pipeline_mode<synchronous>, transform_indices = @transform_12, window_bounds = array<i64: 128, 128>}, {pipeline_mode = #tpu.pipeline_mode<synchronous>, transform_indices = @transform_13, window_bounds = array<i64: 1, 128>}, {pipeline_mode = #tpu.pipeline_mode<synchronous>, transform_indices = @transform_14, window_bounds = array<i64: 128, 128>}, {pipeline_mode = #tpu.pipeline_mode<synchronous>, transform_indices = @transform_15, window_bounds = array<i64: 1, 128>}, {pipeline_mode = #tpu.pipeline_mode<synchronous>, transform_indices = @transform_16, window_bounds = array<i64: 1, 128>}, {pipeline_mode = #tpu.pipeline_mode<synchronous>, transform_indices = @transform_17, window_bounds = array<i64: 1, 128>}, {transform_indices = @transform_18, window_bounds = array<i64: 1, 8, 128>}, {transform_indices = @transform_19, window_bounds = array<i64: 1, 8, 8, 8>}]} {
    %c0 = arith.constant 0 : index
    %c0_0 = arith.constant 0 : index
    %c0_1 = arith.constant 0 : index
    %0 = vector.load %arg1[%c0, %c0_0, %c0_1] : memref<1x8x128xf32, #tpu.memory_space<vmem>>, vector<1x8x128xf32>
    %1 = vector.shape_cast %0 : vector<1x8x128xf32> to vector<8x128xf32>
    %c0_2 = arith.constant 0 : index
    %c0_3 = arith.constant 0 : index
    %c0_4 = arith.constant 0 : index
    %2 = vector.load %arg2[%c0_2, %c0_3, %c0_4] : memref<1x8x128xf32, #tpu.memory_space<vmem>>, vector<1x8x128xf32>
    %3 = vector.shape_cast %2 : vector<1x8x128xf32> to vector<8x128xf32>
    %c0_5 = arith.constant 0 : index
    %c0_6 = arith.constant 0 : index
    %4 = vector.load %arg3[%c0_5, %c0_6] : memref<1x128xf32, #tpu.memory_space<vmem>>, vector<1x128xf32>
    %c0_7 = arith.constant 0 : index
    %c0_8 = arith.constant 0 : index
    %5 = vector.load %arg4[%c0_7, %c0_8] : memref<1x128xf32, #tpu.memory_space<vmem>>, vector<1x128xf32>
    %cst = arith.constant dense<0.000000e+00> : vector<8xf32>
    %6 = vector.multi_reduction <add>, %1, %cst [1] : vector<8x128xf32> to vector<8xf32>
    %7 = vector.shape_cast %6 : vector<8xf32> to vector<8x1xf32>
    %cst_9 = arith.constant 1.280000e+02 : f32
    %8 = vector.broadcast %cst_9 : f32 to vector<8x1xf32>
    %9 = arith.divf %7, %8 : vector<8x1xf32>
    %10 = vector.broadcast %9 : vector<8x1xf32> to vector<8x128xf32>
    %11 = arith.subf %1, %10 : vector<8x128xf32>
    %12 = arith.mulf %11, %11 : vector<8x128xf32>
    %cst_10 = arith.constant dense<0.000000e+00> : vector<8xf32>
    %13 = vector.multi_reduction <add>, %12, %cst_10 [1] : vector<8x128xf32> to vector<8xf32>
    %14 = vector.shape_cast %13 : vector<8xf32> to vector<8x1xf32>
    %cst_11 = arith.constant 1.280000e+02 : f32
    %15 = vector.broadcast %cst_11 : f32 to vector<8x1xf32>
    %16 = arith.divf %14, %15 : vector<8x1xf32>
    %17 = vector.broadcast %9 : vector<8x1xf32> to vector<8x128xf32>
    %18 = arith.subf %1, %17 : vector<8x128xf32>
    %cst_12 = arith.constant 9.99999974E-6 : f32
    %19 = vector.broadcast %cst_12 : f32 to vector<8x1xf32>
    %20 = arith.addf %16, %19 : vector<8x1xf32>
    %21 = math.rsqrt %20 : vector<8x1xf32>
    %22 = vector.broadcast %21 : vector<8x1xf32> to vector<8x128xf32>
    %23 = arith.mulf %18, %22 : vector<8x128xf32>
    %24 = vector.broadcast %4 : vector<1x128xf32> to vector<8x128xf32>
    %25 = arith.mulf %23, %24 : vector<8x128xf32>
    %26 = vector.broadcast %5 : vector<1x128xf32> to vector<8x128xf32>
    %27 = arith.addf %25, %26 : vector<8x128xf32>
    %c0_13 = arith.constant 0 : index
    %c0_14 = arith.constant 0 : index
    %28 = vector.load %arg5[%c0_13, %c0_14] : memref<1x128xf32, #tpu.memory_space<vmem>>, vector<1x128xf32>
    %c0_15 = arith.constant 0 : index
    %c0_16 = arith.constant 0 : index
    %29 = vector.load %arg6[%c0_15, %c0_16] : memref<1x128xf32, #tpu.memory_space<vmem>>, vector<1x128xf32>
    %cst_17 = arith.constant dense<0.000000e+00> : vector<8xf32>
    %30 = vector.multi_reduction <add>, %3, %cst_17 [1] : vector<8x128xf32> to vector<8xf32>
    %31 = vector.shape_cast %30 : vector<8xf32> to vector<8x1xf32>
    %cst_18 = arith.constant 1.280000e+02 : f32
    %32 = vector.broadcast %cst_18 : f32 to vector<8x1xf32>
    %33 = arith.divf %31, %32 : vector<8x1xf32>
    %34 = vector.broadcast %33 : vector<8x1xf32> to vector<8x128xf32>
    %35 = arith.subf %3, %34 : vector<8x128xf32>
    %36 = arith.mulf %35, %35 : vector<8x128xf32>
    %cst_19 = arith.constant dense<0.000000e+00> : vector<8xf32>
    %37 = vector.multi_reduction <add>, %36, %cst_19 [1] : vector<8x128xf32> to vector<8xf32>
    %38 = vector.shape_cast %37 : vector<8xf32> to vector<8x1xf32>
    %cst_20 = arith.constant 1.280000e+02 : f32
    %39 = vector.broadcast %cst_20 : f32 to vector<8x1xf32>
    %40 = arith.divf %38, %39 : vector<8x1xf32>
    %41 = vector.broadcast %33 : vector<8x1xf32> to vector<8x128xf32>
    %42 = arith.subf %3, %41 : vector<8x128xf32>
    %cst_21 = arith.constant 9.99999974E-6 : f32
    %43 = vector.broadcast %cst_21 : f32 to vector<8x1xf32>
    %44 = arith.addf %40, %43 : vector<8x1xf32>
    %45 = math.rsqrt %44 : vector<8x1xf32>
    %46 = vector.broadcast %45 : vector<8x1xf32> to vector<8x128xf32>
    %47 = arith.mulf %42, %46 : vector<8x128xf32>
    %48 = vector.broadcast %28 : vector<1x128xf32> to vector<8x128xf32>
    %49 = arith.mulf %47, %48 : vector<8x128xf32>
    %50 = vector.broadcast %29 : vector<1x128xf32> to vector<8x128xf32>
    %51 = arith.addf %49, %50 : vector<8x128xf32>
    %c0_22 = arith.constant 0 : index
    %c0_23 = arith.constant 0 : index
    %52 = vector.load %arg7[%c0_22, %c0_23] : memref<1x128xf32, #tpu.memory_space<vmem>>, vector<1x128xf32>
    %c0_24 = arith.constant 0 : index
    %c0_25 = arith.constant 0 : index
    %53 = vector.load %arg8[%c0_24, %c0_25] : memref<1x128xf32, #tpu.memory_space<vmem>>, vector<1x128xf32>
    %cst_26 = arith.constant dense<0.000000e+00> : vector<8xf32>
    %54 = vector.multi_reduction <add>, %3, %cst_26 [1] : vector<8x128xf32> to vector<8xf32>
    %55 = vector.shape_cast %54 : vector<8xf32> to vector<8x1xf32>
    %cst_27 = arith.constant 1.280000e+02 : f32
    %56 = vector.broadcast %cst_27 : f32 to vector<8x1xf32>
    %57 = arith.divf %55, %56 : vector<8x1xf32>
    %58 = vector.broadcast %57 : vector<8x1xf32> to vector<8x128xf32>
    %59 = arith.subf %3, %58 : vector<8x128xf32>
    %60 = arith.mulf %59, %59 : vector<8x128xf32>
    %cst_28 = arith.constant dense<0.000000e+00> : vector<8xf32>
    %61 = vector.multi_reduction <add>, %60, %cst_28 [1] : vector<8x128xf32> to vector<8xf32>
    %62 = vector.shape_cast %61 : vector<8xf32> to vector<8x1xf32>
    %cst_29 = arith.constant 1.280000e+02 : f32
    %63 = vector.broadcast %cst_29 : f32 to vector<8x1xf32>
    %64 = arith.divf %62, %63 : vector<8x1xf32>
    %65 = vector.broadcast %57 : vector<8x1xf32> to vector<8x128xf32>
    %66 = arith.subf %3, %65 : vector<8x128xf32>
    %cst_30 = arith.constant 9.99999974E-6 : f32
    %67 = vector.broadcast %cst_30 : f32 to vector<8x1xf32>
    %68 = arith.addf %64, %67 : vector<8x1xf32>
    %69 = math.rsqrt %68 : vector<8x1xf32>
    %70 = vector.broadcast %69 : vector<8x1xf32> to vector<8x128xf32>
    %71 = arith.mulf %66, %70 : vector<8x128xf32>
    %72 = vector.broadcast %52 : vector<1x128xf32> to vector<8x128xf32>
    %73 = arith.mulf %71, %72 : vector<8x128xf32>
    %74 = vector.broadcast %53 : vector<1x128xf32> to vector<8x128xf32>
    %75 = arith.addf %73, %74 : vector<8x128xf32>
    %c0_31 = arith.constant 0 : index
    %c0_32 = arith.constant 0 : index
    %76 = vector.load %arg9[%c0_31, %c0_32] : memref<128x128xf32, #tpu.memory_space<vmem>>, vector<128x128xf32>
    %cst_33 = arith.constant dense<0.000000e+00> : vector<8x128xf32>
    %77 = tpu.matmul %27, %76, %cst_33 {dimension_numbers = #tpu.dot_dimension_numbers<[1], [0], [0], [1], [0, 0, 1, 1], [], []>} : vector<8x128xf32>, vector<128x128xf32>, vector<8x128xf32> -> vector<8x128xf32>
    %c0_34 = arith.constant 0 : index
    %c0_35 = arith.constant 0 : index
    %78 = vector.load %arg10[%c0_34, %c0_35] : memref<1x128xf32, #tpu.memory_space<vmem>>, vector<1x128xf32>
    %79 = vector.broadcast %78 : vector<1x128xf32> to vector<8x128xf32>
    %80 = arith.addf %77, %79 : vector<8x128xf32>
    %81 = vector.shape_cast %80 : vector<8x128xf32> to vector<1x8x128xf32>
    %c0_36 = arith.constant 0 : index
    %c0_37 = arith.constant 0 : index
    %82 = vector.load %arg11[%c0_36, %c0_37] : memref<128x128xf32, #tpu.memory_space<vmem>>, vector<128x128xf32>
    %cst_38 = arith.constant dense<0.000000e+00> : vector<8x128xf32>
    %83 = tpu.matmul %51, %82, %cst_38 {dimension_numbers = #tpu.dot_dimension_numbers<[1], [0], [0], [1], [0, 0, 1, 1], [], []>} : vector<8x128xf32>, vector<128x128xf32>, vector<8x128xf32> -> vector<8x128xf32>
    %c0_39 = arith.constant 0 : index
    %c0_40 = arith.constant 0 : index
    %84 = vector.load %arg12[%c0_39, %c0_40] : memref<1x128xf32, #tpu.memory_space<vmem>>, vector<1x128xf32>
    %85 = vector.broadcast %84 : vector<1x128xf32> to vector<8x128xf32>
    %86 = arith.addf %83, %85 : vector<8x128xf32>
    %87 = vector.shape_cast %86 : vector<8x128xf32> to vector<1x8x128xf32>
    %c0_41 = arith.constant 0 : index
    %c0_42 = arith.constant 0 : index
    %88 = vector.load %arg13[%c0_41, %c0_42] : memref<128x128xf32, #tpu.memory_space<vmem>>, vector<128x128xf32>
    %cst_43 = arith.constant dense<0.000000e+00> : vector<8x128xf32>
    %89 = tpu.matmul %75, %88, %cst_43 {dimension_numbers = #tpu.dot_dimension_numbers<[1], [0], [0], [1], [0, 0, 1, 1], [], []>} : vector<8x128xf32>, vector<128x128xf32>, vector<8x128xf32> -> vector<8x128xf32>
    %c0_44 = arith.constant 0 : index
    %c0_45 = arith.constant 0 : index
    %90 = vector.load %arg14[%c0_44, %c0_45] : memref<1x128xf32, #tpu.memory_space<vmem>>, vector<1x128xf32>
    %91 = vector.broadcast %90 : vector<1x128xf32> to vector<8x128xf32>
    %92 = arith.addf %89, %91 : vector<8x128xf32>
    %93 = vector.shape_cast %92 : vector<8x128xf32> to vector<1x8x128xf32>
    %94 = vector.extract_strided_slice %81 {offsets = [0, 0, 0], sizes = [1, 8, 16], strides = [1, 1, 1]} : vector<1x8x128xf32> to vector<1x8x16xf32>
    %95 = vector.extract_strided_slice %87 {offsets = [0, 0, 0], sizes = [1, 8, 16], strides = [1, 1, 1]} : vector<1x8x128xf32> to vector<1x8x16xf32>
    %96 = vector.extract_strided_slice %93 {offsets = [0, 0, 0], sizes = [1, 8, 16], strides = [1, 1, 1]} : vector<1x8x128xf32> to vector<1x8x16xf32>
    "tpu.trace_start"() <{level = 10 : i32, message = "bqe,bke->bqk"}> : () -> ()
    %cst_46 = arith.constant dense<0.000000e+00> : vector<1x8x8xf32>
    %97 = tpu.matmul %94, %95, %cst_46 {dimension_numbers = #tpu.dot_dimension_numbers<[2], [2], [1], [1], [0, 0, 0, 1, 1, 1], [0], [0]>} : vector<1x8x16xf32>, vector<1x8x16xf32>, vector<1x8x8xf32> -> vector<1x8x8xf32>
    "tpu.trace_stop"() : () -> ()
    %cst_47 = arith.constant 2.500000e-01 : f32
    %98 = vector.broadcast %cst_47 : f32 to vector<1x8x8xf32>
    %99 = arith.mulf %97, %98 : vector<1x8x8xf32>
    %cst_48 = arith.constant dense<0xFF800000> : vector<1x8xf32>
    %100 = vector.multi_reduction <maximumf>, %99, %cst_48 [2] : vector<1x8x8xf32> to vector<1x8xf32>
    %101 = vector.shape_cast %100 : vector<1x8xf32> to vector<1x8x1xf32>
    %102 = vector.broadcast %101 : vector<1x8x1xf32> to vector<1x8x8xf32>
    %103 = arith.subf %99, %102 : vector<1x8x8xf32>
    %104 = math.exp %103 : vector<1x8x8xf32>
    %cst_49 = arith.constant dense<0.000000e+00> : vector<1x8xf32>
    %105 = vector.multi_reduction <add>, %104, %cst_49 [2] : vector<1x8x8xf32> to vector<1x8xf32>
    %106 = vector.shape_cast %105 : vector<1x8xf32> to vector<1x8x1xf32>
    %107 = tpu.reciprocal %106 {approx = true} : vector<1x8x1xf32> -> vector<1x8x1xf32>
    %108 = vector.broadcast %107 : vector<1x8x1xf32> to vector<1x8x8xf32>
    %109 = arith.mulf %104, %108 : vector<1x8x8xf32>
    %c0_50 = arith.constant 0 : index
    %c0_51 = arith.constant 0 : index
    %c0_52 = arith.constant 0 : index
    %c0_53 = arith.constant 0 : index
    %110 = vector.load %arg20[%c0_50, %c0_51, %c0_52, %c0_53] : memref<1x8x8x8xf32, #tpu.memory_space<vmem>>, vector<1x1x8x8xf32>
    %111 = vector.shape_cast %110 : vector<1x1x8x8xf32> to vector<1x8x8xf32>
    %112 = vector.shape_cast %109 : vector<1x8x8xf32> to vector<1x1x8x8xf32>
    tpu.vector_store %arg20[%c0_50, %c0_51, %c0_52, %c0_53], %112 {strides = array<i32>} : memref<1x8x8x8xf32, #tpu.memory_space<vmem>>, vector<1x1x8x8xf32>,
    "tpu.trace_start"() <{level = 10 : i32, message = "bqk,bke->bqe"}> : () -> ()
    %cst_54 = arith.constant dense<0.000000e+00> : vector<1x8x16xf32>
    %113 = tpu.matmul %109, %96, %cst_54 {dimension_numbers = #tpu.dot_dimension_numbers<[2], [1], [1], [2], [0, 0, 0, 1, 1, 2], [0], [0]>} : vector<1x8x8xf32>, vector<1x8x16xf32>, vector<1x8x16xf32> -> vector<1x8x16xf32>
    "tpu.trace_stop"() : () -> ()
    %114 = vector.extract_strided_slice %81 {offsets = [0, 0, 16], sizes = [1, 8, 16], strides = [1, 1, 1]} : vector<1x8x128xf32> to vector<1x8x16xf32>
    %115 = vector.extract_strided_slice %87 {offsets = [0, 0, 16], sizes = [1, 8, 16], strides = [1, 1, 1]} : vector<1x8x128xf32> to vector<1x8x16xf32>
    %116 = vector.extract_strided_slice %93 {offsets = [0, 0, 16], sizes = [1, 8, 16], strides = [1, 1, 1]} : vector<1x8x128xf32> to vector<1x8x16xf32>
    "tpu.trace_start"() <{level = 10 : i32, message = "bqe,bke->bqk"}> : () -> ()
    %cst_55 = arith.constant dense<0.000000e+00> : vector<1x8x8xf32>
    %117 = tpu.matmul %114, %115, %cst_55 {dimension_numbers = #tpu.dot_dimension_numbers<[2], [2], [1], [1], [0, 0, 0, 1, 1, 1], [0], [0]>} : vector<1x8x16xf32>, vector<1x8x16xf32>, vector<1x8x8xf32> -> vector<1x8x8xf32>
    "tpu.trace_stop"() : () -> ()
    %cst_56 = arith.constant 2.500000e-01 : f32
    %118 = vector.broadcast %cst_56 : f32 to vector<1x8x8xf32>
    %119 = arith.mulf %117, %118 : vector<1x8x8xf32>
    %cst_57 = arith.constant dense<0xFF800000> : vector<1x8xf32>
    %120 = vector.multi_reduction <maximumf>, %119, %cst_57 [2] : vector<1x8x8xf32> to vector<1x8xf32>
    %121 = vector.shape_cast %120 : vector<1x8xf32> to vector<1x8x1xf32>
    %122 = vector.broadcast %121 : vector<1x8x1xf32> to vector<1x8x8xf32>
    %123 = arith.subf %119, %122 : vector<1x8x8xf32>
    %124 = math.exp %123 : vector<1x8x8xf32>
    %cst_58 = arith.constant dense<0.000000e+00> : vector<1x8xf32>
    %125 = vector.multi_reduction <add>, %124, %cst_58 [2] : vector<1x8x8xf32> to vector<1x8xf32>
    %126 = vector.shape_cast %125 : vector<1x8xf32> to vector<1x8x1xf32>
    %127 = tpu.reciprocal %126 {approx = true} : vector<1x8x1xf32> -> vector<1x8x1xf32>
    %128 = vector.broadcast %127 : vector<1x8x1xf32> to vector<1x8x8xf32>
    %129 = arith.mulf %124, %128 : vector<1x8x8xf32>
    %c0_59 = arith.constant 0 : index
    %c1 = arith.constant 1 : index
    %c0_60 = arith.constant 0 : index
    %c0_61 = arith.constant 0 : index
    %130 = vector.load %arg20[%c0_59, %c1, %c0_60, %c0_61] : memref<1x8x8x8xf32, #tpu.memory_space<vmem>>, vector<1x1x8x8xf32>
    %131 = vector.shape_cast %130 : vector<1x1x8x8xf32> to vector<1x8x8xf32>
    %132 = vector.shape_cast %129 : vector<1x8x8xf32> to vector<1x1x8x8xf32>
    tpu.vector_store %arg20[%c0_59, %c1, %c0_60, %c0_61], %132 {strides = array<i32>} : memref<1x8x8x8xf32, #tpu.memory_space<vmem>>, vector<1x1x8x8xf32>,
    "tpu.trace_start"() <{level = 10 : i32, message = "bqk,bke->bqe"}> : () -> ()
    %cst_62 = arith.constant dense<0.000000e+00> : vector<1x8x16xf32>
    %133 = tpu.matmul %129, %116, %cst_62 {dimension_numbers = #tpu.dot_dimension_numbers<[2], [1], [1], [2], [0, 0, 0, 1, 1, 2], [0], [0]>} : vector<1x8x8xf32>, vector<1x8x16xf32>, vector<1x8x16xf32> -> vector<1x8x16xf32>
    "tpu.trace_stop"() : () -> ()
    %134 = vector.extract_strided_slice %81 {offsets = [0, 0, 32], sizes = [1, 8, 16], strides = [1, 1, 1]} : vector<1x8x128xf32> to vector<1x8x16xf32>
    %135 = vector.extract_strided_slice %87 {offsets = [0, 0, 32], sizes = [1, 8, 16], strides = [1, 1, 1]} : vector<1x8x128xf32> to vector<1x8x16xf32>
    %136 = vector.extract_strided_slice %93 {offsets = [0, 0, 32], sizes = [1, 8, 16], strides = [1, 1, 1]} : vector<1x8x128xf32> to vector<1x8x16xf32>
    "tpu.trace_start"() <{level = 10 : i32, message = "bqe,bke->bqk"}> : () -> ()
    %cst_63 = arith.constant dense<0.000000e+00> : vector<1x8x8xf32>
    %137 = tpu.matmul %134, %135, %cst_63 {dimension_numbers = #tpu.dot_dimension_numbers<[2], [2], [1], [1], [0, 0, 0, 1, 1, 1], [0], [0]>} : vector<1x8x16xf32>, vector<1x8x16xf32>, vector<1x8x8xf32> -> vector<1x8x8xf32>
    "tpu.trace_stop"() : () -> ()
    %cst_64 = arith.constant 2.500000e-01 : f32
    %138 = vector.broadcast %cst_64 : f32 to vector<1x8x8xf32>
    %139 = arith.mulf %137, %138 : vector<1x8x8xf32>
    %cst_65 = arith.constant dense<0xFF800000> : vector<1x8xf32>
    %140 = vector.multi_reduction <maximumf>, %139, %cst_65 [2] : vector<1x8x8xf32> to vector<1x8xf32>
    %141 = vector.shape_cast %140 : vector<1x8xf32> to vector<1x8x1xf32>
    %142 = vector.broadcast %141 : vector<1x8x1xf32> to vector<1x8x8xf32>
    %143 = arith.subf %139, %142 : vector<1x8x8xf32>
    %144 = math.exp %143 : vector<1x8x8xf32>
    %cst_66 = arith.constant dense<0.000000e+00> : vector<1x8xf32>
    %145 = vector.multi_reduction <add>, %144, %cst_66 [2] : vector<1x8x8xf32> to vector<1x8xf32>
    %146 = vector.shape_cast %145 : vector<1x8xf32> to vector<1x8x1xf32>
    %147 = tpu.reciprocal %146 {approx = true} : vector<1x8x1xf32> -> vector<1x8x1xf32>
    %148 = vector.broadcast %147 : vector<1x8x1xf32> to vector<1x8x8xf32>
    %149 = arith.mulf %144, %148 : vector<1x8x8xf32>
    %c0_67 = arith.constant 0 : index
    %c2 = arith.constant 2 : index
    %c0_68 = arith.constant 0 : index
    %c0_69 = arith.constant 0 : index
    %150 = vector.load %arg20[%c0_67, %c2, %c0_68, %c0_69] : memref<1x8x8x8xf32, #tpu.memory_space<vmem>>, vector<1x1x8x8xf32>
    %151 = vector.shape_cast %150 : vector<1x1x8x8xf32> to vector<1x8x8xf32>
    %152 = vector.shape_cast %149 : vector<1x8x8xf32> to vector<1x1x8x8xf32>
    tpu.vector_store %arg20[%c0_67, %c2, %c0_68, %c0_69], %152 {strides = array<i32>} : memref<1x8x8x8xf32, #tpu.memory_space<vmem>>, vector<1x1x8x8xf32>,
    "tpu.trace_start"() <{level = 10 : i32, message = "bqk,bke->bqe"}> : () -> ()
    %cst_70 = arith.constant dense<0.000000e+00> : vector<1x8x16xf32>
    %153 = tpu.matmul %149, %136, %cst_70 {dimension_numbers = #tpu.dot_dimension_numbers<[2], [1], [1], [2], [0, 0, 0, 1, 1, 2], [0], [0]>} : vector<1x8x8xf32>, vector<1x8x16xf32>, vector<1x8x16xf32> -> vector<1x8x16xf32>
    "tpu.trace_stop"() : () -> ()
    %154 = vector.extract_strided_slice %81 {offsets = [0, 0, 48], sizes = [1, 8, 16], strides = [1, 1, 1]} : vector<1x8x128xf32> to vector<1x8x16xf32>
    %155 = vector.extract_strided_slice %87 {offsets = [0, 0, 48], sizes = [1, 8, 16], strides = [1, 1, 1]} : vector<1x8x128xf32> to vector<1x8x16xf32>
    %156 = vector.extract_strided_slice %93 {offsets = [0, 0, 48], sizes = [1, 8, 16], strides = [1, 1, 1]} : vector<1x8x128xf32> to vector<1x8x16xf32>
    "tpu.trace_start"() <{level = 10 : i32, message = "bqe,bke->bqk"}> : () -> ()
    %cst_71 = arith.constant dense<0.000000e+00> : vector<1x8x8xf32>
    %157 = tpu.matmul %154, %155, %cst_71 {dimension_numbers = #tpu.dot_dimension_numbers<[2], [2], [1], [1], [0, 0, 0, 1, 1, 1], [0], [0]>} : vector<1x8x16xf32>, vector<1x8x16xf32>, vector<1x8x8xf32> -> vector<1x8x8xf32>
    "tpu.trace_stop"() : () -> ()
    %cst_72 = arith.constant 2.500000e-01 : f32
    %158 = vector.broadcast %cst_72 : f32 to vector<1x8x8xf32>
    %159 = arith.mulf %157, %158 : vector<1x8x8xf32>
    %cst_73 = arith.constant dense<0xFF800000> : vector<1x8xf32>
    %160 = vector.multi_reduction <maximumf>, %159, %cst_73 [2] : vector<1x8x8xf32> to vector<1x8xf32>
    %161 = vector.shape_cast %160 : vector<1x8xf32> to vector<1x8x1xf32>
    %162 = vector.broadcast %161 : vector<1x8x1xf32> to vector<1x8x8xf32>
    %163 = arith.subf %159, %162 : vector<1x8x8xf32>
    %164 = math.exp %163 : vector<1x8x8xf32>
    %cst_74 = arith.constant dense<0.000000e+00> : vector<1x8xf32>
    %165 = vector.multi_reduction <add>, %164, %cst_74 [2] : vector<1x8x8xf32> to vector<1x8xf32>
    %166 = vector.shape_cast %165 : vector<1x8xf32> to vector<1x8x1xf32>
    %167 = tpu.reciprocal %166 {approx = true} : vector<1x8x1xf32> -> vector<1x8x1xf32>
    %168 = vector.broadcast %167 : vector<1x8x1xf32> to vector<1x8x8xf32>
    %169 = arith.mulf %164, %168 : vector<1x8x8xf32>
    %c0_75 = arith.constant 0 : index
    %c3 = arith.constant 3 : index
    %c0_76 = arith.constant 0 : index
    %c0_77 = arith.constant 0 : index
    %170 = vector.load %arg20[%c0_75, %c3, %c0_76, %c0_77] : memref<1x8x8x8xf32, #tpu.memory_space<vmem>>, vector<1x1x8x8xf32>
    %171 = vector.shape_cast %170 : vector<1x1x8x8xf32> to vector<1x8x8xf32>
    %172 = vector.shape_cast %169 : vector<1x8x8xf32> to vector<1x1x8x8xf32>
    tpu.vector_store %arg20[%c0_75, %c3, %c0_76, %c0_77], %172 {strides = array<i32>} : memref<1x8x8x8xf32, #tpu.memory_space<vmem>>, vector<1x1x8x8xf32>,
    "tpu.trace_start"() <{level = 10 : i32, message = "bqk,bke->bqe"}> : () -> ()
    %cst_78 = arith.constant dense<0.000000e+00> : vector<1x8x16xf32>
    %173 = tpu.matmul %169, %156, %cst_78 {dimension_numbers = #tpu.dot_dimension_numbers<[2], [1], [1], [2], [0, 0, 0, 1, 1, 2], [0], [0]>} : vector<1x8x8xf32>, vector<1x8x16xf32>, vector<1x8x16xf32> -> vector<1x8x16xf32>
    "tpu.trace_stop"() : () -> ()
    %174 = vector.extract_strided_slice %81 {offsets = [0, 0, 64], sizes = [1, 8, 16], strides = [1, 1, 1]} : vector<1x8x128xf32> to vector<1x8x16xf32>
    %175 = vector.extract_strided_slice %87 {offsets = [0, 0, 64], sizes = [1, 8, 16], strides = [1, 1, 1]} : vector<1x8x128xf32> to vector<1x8x16xf32>
    %176 = vector.extract_strided_slice %93 {offsets = [0, 0, 64], sizes = [1, 8, 16], strides = [1, 1, 1]} : vector<1x8x128xf32> to vector<1x8x16xf32>
    "tpu.trace_start"() <{level = 10 : i32, message = "bqe,bke->bqk"}> : () -> ()
    %cst_79 = arith.constant dense<0.000000e+00> : vector<1x8x8xf32>
    %177 = tpu.matmul %174, %175, %cst_79 {dimension_numbers = #tpu.dot_dimension_numbers<[2], [2], [1], [1], [0, 0, 0, 1, 1, 1], [0], [0]>} : vector<1x8x16xf32>, vector<1x8x16xf32>, vector<1x8x8xf32> -> vector<1x8x8xf32>
    "tpu.trace_stop"() : () -> ()
    %cst_80 = arith.constant 2.500000e-01 : f32
    %178 = vector.broadcast %cst_80 : f32 to vector<1x8x8xf32>
    %179 = arith.mulf %177, %178 : vector<1x8x8xf32>
    %cst_81 = arith.constant dense<0xFF800000> : vector<1x8xf32>
    %180 = vector.multi_reduction <maximumf>, %179, %cst_81 [2] : vector<1x8x8xf32> to vector<1x8xf32>
    %181 = vector.shape_cast %180 : vector<1x8xf32> to vector<1x8x1xf32>
    %182 = vector.broadcast %181 : vector<1x8x1xf32> to vector<1x8x8xf32>
    %183 = arith.subf %179, %182 : vector<1x8x8xf32>
    %184 = math.exp %183 : vector<1x8x8xf32>
    %cst_82 = arith.constant dense<0.000000e+00> : vector<1x8xf32>
    %185 = vector.multi_reduction <add>, %184, %cst_82 [2] : vector<1x8x8xf32> to vector<1x8xf32>
    %186 = vector.shape_cast %185 : vector<1x8xf32> to vector<1x8x1xf32>
    %187 = tpu.reciprocal %186 {approx = true} : vector<1x8x1xf32> -> vector<1x8x1xf32>
    %188 = vector.broadcast %187 : vector<1x8x1xf32> to vector<1x8x8xf32>
    %189 = arith.mulf %184, %188 : vector<1x8x8xf32>
    %c0_83 = arith.constant 0 : index
    %c4 = arith.constant 4 : index
    %c0_84 = arith.constant 0 : index
    %c0_85 = arith.constant 0 : index
    %190 = vector.load %arg20[%c0_83, %c4, %c0_84, %c0_85] : memref<1x8x8x8xf32, #tpu.memory_space<vmem>>, vector<1x1x8x8xf32>
    %191 = vector.shape_cast %190 : vector<1x1x8x8xf32> to vector<1x8x8xf32>
    %192 = vector.shape_cast %189 : vector<1x8x8xf32> to vector<1x1x8x8xf32>
    tpu.vector_store %arg20[%c0_83, %c4, %c0_84, %c0_85], %192 {strides = array<i32>} : memref<1x8x8x8xf32, #tpu.memory_space<vmem>>, vector<1x1x8x8xf32>,
    "tpu.trace_start"() <{level = 10 : i32, message = "bqk,bke->bqe"}> : () -> ()
    %cst_86 = arith.constant dense<0.000000e+00> : vector<1x8x16xf32>
    %193 = tpu.matmul %189, %176, %cst_86 {dimension_numbers = #tpu.dot_dimension_numbers<[2], [1], [1], [2], [0, 0, 0, 1, 1, 2], [0], [0]>} : vector<1x8x8xf32>, vector<1x8x16xf32>, vector<1x8x16xf32> -> vector<1x8x16xf32>
    "tpu.trace_stop"() : () -> ()
    %194 = vector.extract_strided_slice %81 {offsets = [0, 0, 80], sizes = [1, 8, 16], strides = [1, 1, 1]} : vector<1x8x128xf32> to vector<1x8x16xf32>
    %195 = vector.extract_strided_slice %87 {offsets = [0, 0, 80], sizes = [1, 8, 16], strides = [1, 1, 1]} : vector<1x8x128xf32> to vector<1x8x16xf32>
    %196 = vector.extract_strided_slice %93 {offsets = [0, 0, 80], sizes = [1, 8, 16], strides = [1, 1, 1]} : vector<1x8x128xf32> to vector<1x8x16xf32>
    "tpu.trace_start"() <{level = 10 : i32, message = "bqe,bke->bqk"}> : () -> ()
    %cst_87 = arith.constant dense<0.000000e+00> : vector<1x8x8xf32>
    %197 = tpu.matmul %194, %195, %cst_87 {dimension_numbers = #tpu.dot_dimension_numbers<[2], [2], [1], [1], [0, 0, 0, 1, 1, 1], [0], [0]>} : vector<1x8x16xf32>, vector<1x8x16xf32>, vector<1x8x8xf32> -> vector<1x8x8xf32>
    "tpu.trace_stop"() : () -> ()
    %cst_88 = arith.constant 2.500000e-01 : f32
    %198 = vector.broadcast %cst_88 : f32 to vector<1x8x8xf32>
    %199 = arith.mulf %197, %198 : vector<1x8x8xf32>
    %cst_89 = arith.constant dense<0xFF800000> : vector<1x8xf32>
    %200 = vector.multi_reduction <maximumf>, %199, %cst_89 [2] : vector<1x8x8xf32> to vector<1x8xf32>
    %201 = vector.shape_cast %200 : vector<1x8xf32> to vector<1x8x1xf32>
    %202 = vector.broadcast %201 : vector<1x8x1xf32> to vector<1x8x8xf32>
    %203 = arith.subf %199, %202 : vector<1x8x8xf32>
    %204 = math.exp %203 : vector<1x8x8xf32>
    %cst_90 = arith.constant dense<0.000000e+00> : vector<1x8xf32>
    %205 = vector.multi_reduction <add>, %204, %cst_90 [2] : vector<1x8x8xf32> to vector<1x8xf32>
    %206 = vector.shape_cast %205 : vector<1x8xf32> to vector<1x8x1xf32>
    %207 = tpu.reciprocal %206 {approx = true} : vector<1x8x1xf32> -> vector<1x8x1xf32>
    %208 = vector.broadcast %207 : vector<1x8x1xf32> to vector<1x8x8xf32>
    %209 = arith.mulf %204, %208 : vector<1x8x8xf32>
    %c0_91 = arith.constant 0 : index
    %c5 = arith.constant 5 : index
    %c0_92 = arith.constant 0 : index
    %c0_93 = arith.constant 0 : index
    %210 = vector.load %arg20[%c0_91, %c5, %c0_92, %c0_93] : memref<1x8x8x8xf32, #tpu.memory_space<vmem>>, vector<1x1x8x8xf32>
    %211 = vector.shape_cast %210 : vector<1x1x8x8xf32> to vector<1x8x8xf32>
    %212 = vector.shape_cast %209 : vector<1x8x8xf32> to vector<1x1x8x8xf32>
    tpu.vector_store %arg20[%c0_91, %c5, %c0_92, %c0_93], %212 {strides = array<i32>} : memref<1x8x8x8xf32, #tpu.memory_space<vmem>>, vector<1x1x8x8xf32>,
    "tpu.trace_start"() <{level = 10 : i32, message = "bqk,bke->bqe"}> : () -> ()
    %cst_94 = arith.constant dense<0.000000e+00> : vector<1x8x16xf32>
    %213 = tpu.matmul %209, %196, %cst_94 {dimension_numbers = #tpu.dot_dimension_numbers<[2], [1], [1], [2], [0, 0, 0, 1, 1, 2], [0], [0]>} : vector<1x8x8xf32>, vector<1x8x16xf32>, vector<1x8x16xf32> -> vector<1x8x16xf32>
    "tpu.trace_stop"() : () -> ()
    %214 = vector.extract_strided_slice %81 {offsets = [0, 0, 96], sizes = [1, 8, 16], strides = [1, 1, 1]} : vector<1x8x128xf32> to vector<1x8x16xf32>
    %215 = vector.extract_strided_slice %87 {offsets = [0, 0, 96], sizes = [1, 8, 16], strides = [1, 1, 1]} : vector<1x8x128xf32> to vector<1x8x16xf32>
    %216 = vector.extract_strided_slice %93 {offsets = [0, 0, 96], sizes = [1, 8, 16], strides = [1, 1, 1]} : vector<1x8x128xf32> to vector<1x8x16xf32>
    "tpu.trace_start"() <{level = 10 : i32, message = "bqe,bke->bqk"}> : () -> ()
    %cst_95 = arith.constant dense<0.000000e+00> : vector<1x8x8xf32>
    %217 = tpu.matmul %214, %215, %cst_95 {dimension_numbers = #tpu.dot_dimension_numbers<[2], [2], [1], [1], [0, 0, 0, 1, 1, 1], [0], [0]>} : vector<1x8x16xf32>, vector<1x8x16xf32>, vector<1x8x8xf32> -> vector<1x8x8xf32>
    "tpu.trace_stop"() : () -> ()
    %cst_96 = arith.constant 2.500000e-01 : f32
    %218 = vector.broadcast %cst_96 : f32 to vector<1x8x8xf32>
    %219 = arith.mulf %217, %218 : vector<1x8x8xf32>
    %cst_97 = arith.constant dense<0xFF800000> : vector<1x8xf32>
    %220 = vector.multi_reduction <maximumf>, %219, %cst_97 [2] : vector<1x8x8xf32> to vector<1x8xf32>
    %221 = vector.shape_cast %220 : vector<1x8xf32> to vector<1x8x1xf32>
    %222 = vector.broadcast %221 : vector<1x8x1xf32> to vector<1x8x8xf32>
    %223 = arith.subf %219, %222 : vector<1x8x8xf32>
    %224 = math.exp %223 : vector<1x8x8xf32>
    %cst_98 = arith.constant dense<0.000000e+00> : vector<1x8xf32>
    %225 = vector.multi_reduction <add>, %224, %cst_98 [2] : vector<1x8x8xf32> to vector<1x8xf32>
    %226 = vector.shape_cast %225 : vector<1x8xf32> to vector<1x8x1xf32>
    %227 = tpu.reciprocal %226 {approx = true} : vector<1x8x1xf32> -> vector<1x8x1xf32>
    %228 = vector.broadcast %227 : vector<1x8x1xf32> to vector<1x8x8xf32>
    %229 = arith.mulf %224, %228 : vector<1x8x8xf32>
    %c0_99 = arith.constant 0 : index
    %c6 = arith.constant 6 : index
    %c0_100 = arith.constant 0 : index
    %c0_101 = arith.constant 0 : index
    %230 = vector.load %arg20[%c0_99, %c6, %c0_100, %c0_101] : memref<1x8x8x8xf32, #tpu.memory_space<vmem>>, vector<1x1x8x8xf32>
    %231 = vector.shape_cast %230 : vector<1x1x8x8xf32> to vector<1x8x8xf32>
    %232 = vector.shape_cast %229 : vector<1x8x8xf32> to vector<1x1x8x8xf32>
    tpu.vector_store %arg20[%c0_99, %c6, %c0_100, %c0_101], %232 {strides = array<i32>} : memref<1x8x8x8xf32, #tpu.memory_space<vmem>>, vector<1x1x8x8xf32>,
    "tpu.trace_start"() <{level = 10 : i32, message = "bqk,bke->bqe"}> : () -> ()
    %cst_102 = arith.constant dense<0.000000e+00> : vector<1x8x16xf32>
    %233 = tpu.matmul %229, %216, %cst_102 {dimension_numbers = #tpu.dot_dimension_numbers<[2], [1], [1], [2], [0, 0, 0, 1, 1, 2], [0], [0]>} : vector<1x8x8xf32>, vector<1x8x16xf32>, vector<1x8x16xf32> -> vector<1x8x16xf32>
    "tpu.trace_stop"() : () -> ()
    %234 = vector.extract_strided_slice %81 {offsets = [0, 0, 112], sizes = [1, 8, 16], strides = [1, 1, 1]} : vector<1x8x128xf32> to vector<1x8x16xf32>
    %235 = vector.extract_strided_slice %87 {offsets = [0, 0, 112], sizes = [1, 8, 16], strides = [1, 1, 1]} : vector<1x8x128xf32> to vector<1x8x16xf32>
    %236 = vector.extract_strided_slice %93 {offsets = [0, 0, 112], sizes = [1, 8, 16], strides = [1, 1, 1]} : vector<1x8x128xf32> to vector<1x8x16xf32>
    "tpu.trace_start"() <{level = 10 : i32, message = "bqe,bke->bqk"}> : () -> ()
    %cst_103 = arith.constant dense<0.000000e+00> : vector<1x8x8xf32>
    %237 = tpu.matmul %234, %235, %cst_103 {dimension_numbers = #tpu.dot_dimension_numbers<[2], [2], [1], [1], [0, 0, 0, 1, 1, 1], [0], [0]>} : vector<1x8x16xf32>, vector<1x8x16xf32>, vector<1x8x8xf32> -> vector<1x8x8xf32>
    "tpu.trace_stop"() : () -> ()
    %cst_104 = arith.constant 2.500000e-01 : f32
    %238 = vector.broadcast %cst_104 : f32 to vector<1x8x8xf32>
    %239 = arith.mulf %237, %238 : vector<1x8x8xf32>
    %cst_105 = arith.constant dense<0xFF800000> : vector<1x8xf32>
    %240 = vector.multi_reduction <maximumf>, %239, %cst_105 [2] : vector<1x8x8xf32> to vector<1x8xf32>
    %241 = vector.shape_cast %240 : vector<1x8xf32> to vector<1x8x1xf32>
    %242 = vector.broadcast %241 : vector<1x8x1xf32> to vector<1x8x8xf32>
    %243 = arith.subf %239, %242 : vector<1x8x8xf32>
    %244 = math.exp %243 : vector<1x8x8xf32>
    %cst_106 = arith.constant dense<0.000000e+00> : vector<1x8xf32>
    %245 = vector.multi_reduction <add>, %244, %cst_106 [2] : vector<1x8x8xf32> to vector<1x8xf32>
    %246 = vector.shape_cast %245 : vector<1x8xf32> to vector<1x8x1xf32>
    %247 = tpu.reciprocal %246 {approx = true} : vector<1x8x1xf32> -> vector<1x8x1xf32>
    %248 = vector.broadcast %247 : vector<1x8x1xf32> to vector<1x8x8xf32>
    %249 = arith.mulf %244, %248 : vector<1x8x8xf32>
    %c0_107 = arith.constant 0 : index
    %c7 = arith.constant 7 : index
    %c0_108 = arith.constant 0 : index
    %c0_109 = arith.constant 0 : index
    %250 = vector.load %arg20[%c0_107, %c7, %c0_108, %c0_109] : memref<1x8x8x8xf32, #tpu.memory_space<vmem>>, vector<1x1x8x8xf32>
    %251 = vector.shape_cast %250 : vector<1x1x8x8xf32> to vector<1x8x8xf32>
    %252 = vector.shape_cast %249 : vector<1x8x8xf32> to vector<1x1x8x8xf32>
    tpu.vector_store %arg20[%c0_107, %c7, %c0_108, %c0_109], %252 {strides = array<i32>} : memref<1x8x8x8xf32, #tpu.memory_space<vmem>>, vector<1x1x8x8xf32>,
    "tpu.trace_start"() <{level = 10 : i32, message = "bqk,bke->bqe"}> : () -> ()
    %cst_110 = arith.constant dense<0.000000e+00> : vector<1x8x16xf32>
    %253 = tpu.matmul %249, %236, %cst_110 {dimension_numbers = #tpu.dot_dimension_numbers<[2], [1], [1], [2], [0, 0, 0, 1, 1, 2], [0], [0]>} : vector<1x8x8xf32>, vector<1x8x16xf32>, vector<1x8x16xf32> -> vector<1x8x16xf32>
    "tpu.trace_stop"() : () -> ()
    %254 = tpu.concatenate %113, %133, %153, %173, %193, %213, %233, %253 in 2 : vector<1x8x16xf32>, vector<1x8x16xf32>, vector<1x8x16xf32>, vector<1x8x16xf32>, vector<1x8x16xf32>, vector<1x8x16xf32>, vector<1x8x16xf32>, vector<1x8x16xf32> -> vector<1x8x128xf32>
    %255 = vector.shape_cast %254 : vector<1x8x128xf32> to vector<8x128xf32>
    %c0_111 = arith.constant 0 : index
    %c0_112 = arith.constant 0 : index
    %256 = vector.load %arg15[%c0_111, %c0_112] : memref<128x128xf32, #tpu.memory_space<vmem>>, vector<128x128xf32>
    %cst_113 = arith.constant dense<0.000000e+00> : vector<8x128xf32>
    %257 = tpu.matmul %255, %256, %cst_113 {dimension_numbers = #tpu.dot_dimension_numbers<[1], [0], [0], [1], [0, 0, 1, 1], [], []>} : vector<8x128xf32>, vector<128x128xf32>, vector<8x128xf32> -> vector<8x128xf32>
    %c0_114 = arith.constant 0 : index
    %c0_115 = arith.constant 0 : index
    %258 = vector.load %arg16[%c0_114, %c0_115] : memref<1x128xf32, #tpu.memory_space<vmem>>, vector<1x128xf32>
    %259 = vector.broadcast %258 : vector<1x128xf32> to vector<8x128xf32>
    %260 = arith.addf %257, %259 : vector<8x128xf32>
    %261 = arith.addf %260, %1 : vector<8x128xf32>
    %c0_116 = arith.constant 0 : index
    %c0_117 = arith.constant 0 : index
    %262 = vector.load %arg17[%c0_116, %c0_117] : memref<1x128xf32, #tpu.memory_space<vmem>>, vector<1x128xf32>
    %c0_118 = arith.constant 0 : index
    %c0_119 = arith.constant 0 : index
    %263 = vector.load %arg18[%c0_118, %c0_119] : memref<1x128xf32, #tpu.memory_space<vmem>>, vector<1x128xf32>
    %cst_120 = arith.constant dense<0.000000e+00> : vector<8xf32>
    %264 = vector.multi_reduction <add>, %261, %cst_120 [1] : vector<8x128xf32> to vector<8xf32>
    %265 = vector.shape_cast %264 : vector<8xf32> to vector<8x1xf32>
    %cst_121 = arith.constant 1.280000e+02 : f32
    %266 = vector.broadcast %cst_121 : f32 to vector<8x1xf32>
    %267 = arith.divf %265, %266 : vector<8x1xf32>
    %268 = vector.broadcast %267 : vector<8x1xf32> to vector<8x128xf32>
    %269 = arith.subf %261, %268 : vector<8x128xf32>
    %270 = arith.mulf %269, %269 : vector<8x128xf32>
    %cst_122 = arith.constant dense<0.000000e+00> : vector<8xf32>
    %271 = vector.multi_reduction <add>, %270, %cst_122 [1] : vector<8x128xf32> to vector<8xf32>
    %272 = vector.shape_cast %271 : vector<8xf32> to vector<8x1xf32>
    %cst_123 = arith.constant 1.280000e+02 : f32
    %273 = vector.broadcast %cst_123 : f32 to vector<8x1xf32>
    %274 = arith.divf %272, %273 : vector<8x1xf32>
    %275 = vector.broadcast %267 : vector<8x1xf32> to vector<8x128xf32>
    %276 = arith.subf %261, %275 : vector<8x128xf32>
    %cst_124 = arith.constant 9.99999974E-6 : f32
    %277 = vector.broadcast %cst_124 : f32 to vector<8x1xf32>
    %278 = arith.addf %274, %277 : vector<8x1xf32>
    %279 = math.rsqrt %278 : vector<8x1xf32>
    %280 = vector.broadcast %279 : vector<8x1xf32> to vector<8x128xf32>
    %281 = arith.mulf %276, %280 : vector<8x128xf32>
    %282 = vector.broadcast %262 : vector<1x128xf32> to vector<8x128xf32>
    %283 = arith.mulf %281, %282 : vector<8x128xf32>
    %284 = vector.broadcast %263 : vector<1x128xf32> to vector<8x128xf32>
    %285 = arith.addf %283, %284 : vector<8x128xf32>
    %286 = vector.shape_cast %285 : vector<8x128xf32> to vector<1x8x128xf32>
    %c0_125 = arith.constant 0 : index
    %c0_126 = arith.constant 0 : index
    %c0_127 = arith.constant 0 : index
    %287 = vector.load %arg19[%c0_125, %c0_126, %c0_127] : memref<1x8x128xf32, #tpu.memory_space<vmem>>, vector<1x8x128xf32>
    tpu.vector_store %arg19[%c0_125, %c0_126, %c0_127], %286 {strides = array<i32>} : memref<1x8x128xf32, #tpu.memory_space<vmem>>, vector<1x8x128xf32>,
    return
  }
  func.func @transform_0(%arg0: i32) -> (i32, i32, i32) {
    %c0_i32 = arith.constant 0 : i32
    %c0_i32_0 = arith.constant 0 : i32
    %c0_i32_1 = arith.constant 0 : i32
    return %arg0, %c0_i32, %c0_i32_0 : i32, i32, i32
  }
  func.func @transform_1(%arg0: i32) -> (i32, i32, i32) {
    %c0_i32 = arith.constant 0 : i32
    %c0_i32_0 = arith.constant 0 : i32
    %c0_i32_1 = arith.constant 0 : i32
    return %arg0, %c0_i32, %c0_i32_0 : i32, i32, i32
  }
  func.func @transform_2(%arg0: i32) -> (i32, i32) {
    %c0_i32 = arith.constant 0 : i32
    %c0_i32_0 = arith.constant 0 : i32
    %c0_i32_1 = arith.constant 0 : i32
    return %c0_i32, %c0_i32_0 : i32, i32
  }
  func.func @transform_3(%arg0: i32) -> (i32, i32) {
    %c0_i32 = arith.constant 0 : i32
    %c0_i32_0 = arith.constant 0 : i32
    %c0_i32_1 = arith.constant 0 : i32
    return %c0_i32, %c0_i32_0 : i32, i32
  }
  func.func @transform_4(%arg0: i32) -> (i32, i32) {
    %c0_i32 = arith.constant 0 : i32
    %c0_i32_0 = arith.constant 0 : i32
    %c0_i32_1 = arith.constant 0 : i32
    return %c0_i32, %c0_i32_0 : i32, i32
  }
  func.func @transform_5(%arg0: i32) -> (i32, i32) {
    %c0_i32 = arith.constant 0 : i32
    %c0_i32_0 = arith.constant 0 : i32
    %c0_i32_1 = arith.constant 0 : i32
    return %c0_i32, %c0_i32_0 : i32, i32
  }
  func.func @transform_6(%arg0: i32) -> (i32, i32) {
    %c0_i32 = arith.constant 0 : i32
    %c0_i32_0 = arith.constant 0 : i32
    %c0_i32_1 = arith.constant 0 : i32
    return %c0_i32, %c0_i32_0 : i32, i32
  }
  func.func @transform_7(%arg0: i32) -> (i32, i32) {
    %c0_i32 = arith.constant 0 : i32
    %c0_i32_0 = arith.constant 0 : i32
    %c0_i32_1 = arith.constant 0 : i32
    return %c0_i32, %c0_i32_0 : i32, i32
  }
  func.func @transform_8(%arg0: i32) -> (i32, i32) {
    %c0_i32 = arith.constant 0 : i32
    %c0_i32_0 = arith.constant 0 : i32
    %c0_i32_1 = arith.constant 0 : i32
    return %c0_i32, %c0_i32_0 : i32, i32
  }
  func.func @transform_9(%arg0: i32) -> (i32, i32) {
    %c0_i32 = arith.constant 0 : i32
    %c0_i32_0 = arith.constant 0 : i32
    %c0_i32_1 = arith.constant 0 : i32
    return %c0_i32, %c0_i32_0 : i32, i32
  }
  func.func @transform_10(%arg0: i32) -> (i32, i32) {
    %c0_i32 = arith.constant 0 : i32
    %c0_i32_0 = arith.constant 0 : i32
    %c0_i32_1 = arith.constant 0 : i32
    return %c0_i32, %c0_i32_0 : i32, i32
  }
  func.func @transform_11(%arg0: i32) -> (i32, i32) {
    %c0_i32 = arith.constant 0 : i32
    %c0_i32_0 = arith.constant 0 : i32
    %c0_i32_1 = arith.constant 0 : i32
    return %c0_i32, %c0_i32_0 : i32, i32
  }
  func.func @transform_12(%arg0: i32) -> (i32, i32) {
    %c0_i32 = arith.constant 0 : i32
    %c0_i32_0 = arith.constant 0 : i32
    %c0_i32_1 = arith.constant 0 : i32
    return %c0_i32, %c0_i32_0 : i32, i32
  }
  func.func @transform_13(%arg0: i32) -> (i32, i32) {
    %c0_i32 = arith.constant 0 : i32
    %c0_i32_0 = arith.constant 0 : i32
    %c0_i32_1 = arith.constant 0 : i32
    return %c0_i32, %c0_i32_0 : i32, i32
  }
  func.func @transform_14(%arg0: i32) -> (i32, i32) {
    %c0_i32 = arith.constant 0 : i32
    %c0_i32_0 = arith.constant 0 : i32
    %c0_i32_1 = arith.constant 0 : i32
    return %c0_i32, %c0_i32_0 : i32, i32
  }
  func.func @transform_15(%arg0: i32) -> (i32, i32) {
    %c0_i32 = arith.constant 0 : i32
    %c0_i32_0 = arith.constant 0 : i32
    %c0_i32_1 = arith.constant 0 : i32
    return %c0_i32, %c0_i32_0 : i32, i32
  }
  func.func @transform_16(%arg0: i32) -> (i32, i32) {
    %c0_i32 = arith.constant 0 : i32
    %c0_i32_0 = arith.constant 0 : i32
    %c0_i32_1 = arith.constant 0 : i32
    return %c0_i32, %c0_i32_0 : i32, i32
  }
  func.func @transform_17(%arg0: i32) -> (i32, i32) {
    %c0_i32 = arith.constant 0 : i32
    %c0_i32_0 = arith.constant 0 : i32
    %c0_i32_1 = arith.constant 0 : i32
    return %c0_i32, %c0_i32_0 : i32, i32
  }
  func.func @transform_18(%arg0: i32) -> (i32, i32, i32) {
    %c0_i32 = arith.constant 0 : i32
    %c0_i32_0 = arith.constant 0 : i32
    %c0_i32_1 = arith.constant 0 : i32
    return %arg0, %c0_i32, %c0_i32_0 : i32, i32, i32
  }
  func.func @transform_19(%arg0: i32) -> (i32, i32, i32, i32) {
    %c0_i32 = arith.constant 0 : i32
    %c0_i32_0 = arith.constant 0 : i32
    %c0_i32_1 = arith.constant 0 : i32
    %c0_i32_2 = arith.constant 0 : i32
    return %arg0, %c0_i32, %c0_i32_0, %c0_i32_1 : i32, i32, i32, i32
  }
}

</mosaic_0001>

<bundles_post_ra>
// kernel: tpu_custom_call.1
= control target key start
LH: loop header
LB: loop body
LE: loop exit
PB: predicated region body
PF: predicated region fallthrough
CT: control target
= control target key end

     0   :  { %s4317_s0 = inlined_call_operand.hbm [shape: f32[2,8,128], index: 0, kind: input, shape index: {}]   ;;  %s4318_s1 = inlined_call_operand.hbm [shape: f32[2,8,128], index: 1, kind: input, shape index: {}]   ;;  %s4319_s2 = inlined_call_operand.vmem [shape: f32[1,128], index: 2, kind: input, shape index: {}]   ;;  %s4320_s3 = inlined_call_operand.vmem [shape: f32[1,128], index: 3, kind: input, shape index: {}]   ;;  %s4321_s4 = inlined_call_operand.vmem [shape: f32[1,128], index: 4, kind: input, shape index: {}]   ;;  %s4322_s5 = inlined_call_operand.vmem [shape: f32[1,128], index: 5, kind: input, shape index: {}]   ;;  %s4323_s6 = inlined_call_operand.vmem [shape: f32[1,128], index: 6, kind: input, shape index: {}]   ;;  %s4324_s7 = inlined_call_operand.vmem [shape: f32[1,128], index: 7, kind: input, shape index: {}]   ;;  %s4325_s8 = inlined_call_operand.hbm [shape: f32[128,128], index: 8, kind: input, shape index: {}]   ;;  %s4326_s9 = inlined_call_operand.vmem [shape: f32[1,128], index: 9, kind: input, shape index: {}]   ;;  %s4327_s10 = inlined_call_operand.hbm [shape: f32[128,128], index: 10, kind: input, shape index: {}]   ;;  %s4328_s11 = inlined_call_operand.vmem [shape: f32[1,128], index: 11, kind: input, shape index: {}]   ;;  %s4329_s12 = inlined_call_operand.hbm [shape: f32[128,128], index: 12, kind: input, shape index: {}]   ;;  %s4330_s13 = inlined_call_operand.vmem [shape: f32[1,128], index: 13, kind: input, shape index: {}]   ;;  %s4331_s14 = inlined_call_operand.hbm [shape: f32[128,128], index: 14, kind: input, shape index: {}]   ;;  %s4332_s15 = inlined_call_operand.vmem [shape: f32[1,128], index: 15, kind: input, shape index: {}]   ;;  %s4333_s16 = inlined_call_operand.vmem [shape: f32[1,128], index: 16, kind: input, shape index: {}]   ;;  %s4334_s17 = inlined_call_operand.vmem [shape: f32[1,128], index: 17, kind: input, shape index: {}]   ;;  %s4335_s18 = inlined_call_operand.hbm [shape: f32[2,8,128], index: 18, kind: output, shape index: {0}]   ;;  %s4336_s19 = inlined_call_operand.hbm [shape: f32[2,8,8,8], index: 19, kind: output, shape index: {1}]  }
   0x1   :  { %4352 = sst [smem:[#allocation29_spill]] %s4317_s0 }
   0x2   :  { %4353 = sst [smem:[#allocation30_spill]] %s4318_s1 }
   0x3   :  { %4354 = sst [smem:[#allocation31_spill]] %s4319_s2 }
   0x4   :  { %4355 = sst [smem:[#allocation32_spill]] %s4320_s3 }
   0x5   :  { %4356 = sst [smem:[#allocation33_spill]] %s4325_s8 }
   0x6   :  { %4357 = sst [smem:[#allocation34_spill]] %s4327_s10 }
   0x7   :  { %4358 = sst [smem:[#allocation35_spill]] %s4329_s12 }
   0x8   :  { %4359 = sst [smem:[#allocation36_spill]] %s4331_s14 }
   0x9   :  { %4360 = sst [smem:[#allocation37_spill]] %s4332_s15 }
   0xa   :  { %4361 = sst [smem:[#allocation38_spill]] %s4333_s16 }
   0xb   :  { %4362 = sst [smem:[#allocation39_spill]] %s4334_s17 }
   0xc   :  { %4363 = sst [smem:[#allocation40_spill]] %s4335_s18 }
   0xd   :  { %4364 = sst [smem:[#allocation41_spill]] %s4336_s19 }
   0xe   :  { %25 = vsyncpa [#allocation3], 0 }
   0xf   :  { %27 = vsyncpa [#allocation3 + $0x1], 0 }
  0x10   :  { %28 = vsyncpa [#allocation6], 0 }
  0x11   :  { %30 = vsyncpa [#allocation6 + $0x1], 0 }
  0x12   :  { %31 = vsyncpa [#allocation9], 0 }
  0x13   :  { %32 = vsyncpa [#allocation12], 0 }
  0x14   :  { %33 = vsyncpa [#allocation4], 0 }
  0x15   :  { %35 = vsyncpa [#allocation4 + $0x1], 0 }
  0x16   :  { %36 = vsyncpa [#allocation15], 0 }
  0x17   :  { %38 = vsyncpa [#allocation15 + $0x1], 0  ;;  %s3711_s0 = smov 0   ;;  %s3713_s30 = smov 0  }
  0x18   :  { %s3715_s20 = smov 0   ;;  %s3717_s21 = smov 0  }
  0x19 LB: > { %4365 = sst [smem:[#allocation23_spill]] %s3576_s0  ;;  %s3590_s1 = smov [#allocation7]   ;;  %s3588_s21 = sphi %s3717_s21, %s4407_s21   ;;  %s3584_s20 = sphi %s3715_s20, %s4409_s20   ;;  %s3580_s30 = sphi %s3713_s30, %s4411_s30   ;;  %s3576_s0 = sphi %s3711_s0, %s4410_s0  }
  0x1a   : > { %4366 = sst [smem:[#allocation24_spill]] %s3584_s20  ;;  %s519_s22 = sshll.u32 %s3590_s1, 4  ;;  %s520_s22 = int_to_ptr.vmem [resolvable:$true] %s519_s22 }
  0x1b   : > { %s3732_s2 = sadd.s32 4294967295, %s3588_s21   ;;  %p2779_p0 = scmp.ge.s32.totalorder %s3588_s21, 1 }
  0x1c   : > { %p4348_p1 = scmp.eq.s32.totalorder %s3732_s2, 0  ;;  %p489_p2 = scmp.lt.s32.totalorder %s3588_s21, 3 }
  0x1d   : > { %s3591_s24 = smov [#allocation8]   ;;  %s3592_s26 = smov [#allocation10]  }
  0x1e   : > { %p3737_p3 = pnand %p2779_p0, %p489_p2  ;;  %s535_s25 = sshll.u32 %s3591_s24, 4  ;;  %s3750_s25 = int_to_ptr.vmem [resolvable:$true] %s535_s25 }
  0x1f   : > { %s551_s27 = sshll.u32 %s3592_s26, 4  ;;  %s3329_s28 = scalar_lea.vmem %s520_s22, 2048  ;;  %s3752_s27 = int_to_ptr.vmem [resolvable:$true] %s551_s27 }
  0x20   : > { %s4367_s23 = scalar_select %p3737_p3, 1, 0 }
  0x21   : > { %p3193_p5 = pneg %p3737_p3  ;;  %p3330_p8 = scmp.ne.s32.totalorder %s520_s22, %s3329_s28 }
  0x22   : > { %p3337_p11 = scmp.lt.s32.totalorder %s520_s22, %s520_s22  ;;  %p3338_p12 = scmp.lt.s32.totalorder %s3329_s28, %s3329_s28 }
  0x23   : > { %p3746_p6 = pnand %p3193_p5, %p4348_p1 }
  0x24   : > { %p3339_p13 = por %p3338_p12, %p3337_p11 }
  0x25   : > { %p3320_p7 = pneg %p3746_p6 }
  0x27   : > { %p3332_p9 = pnand %p3330_p8, %p3320_p7 }
  0x29   : > { %p3333_p10 = pneg %p3332_p9 }
  0x2b   : > { %p3340_p0 = pnand %p3339_p13, %p3333_p10 }
  0x2d   : > { %3343 = shalt.err (!%p3340_p0)
}
  0x2e   : > { %s3593_s29 = smov 128   ;;  %s3594_s1 = smov 8  }
  0x2f   : > { %s4369_s8 = sld [smem:[#allocation33_spill]]  ;;  %s3355_s18 = scalar_lea.vmem %s3750_s25, 2048 }
  0x30   : > { %p3356_p2 = scmp.ne.s32.totalorder %s3750_s25, %s3355_s18  ;;  %p3363_p9 = scmp.lt.s32.totalorder %s3750_s25, %s3750_s25 }
  0x31   : > { %p3364_p10 = scmp.lt.s32.totalorder %s3355_s18, %s3355_s18 }
  0x32   : > { %p3358_p5 = pnand %p3356_p2, %p3320_p7 }
  0x33   : > { %p3365_p11 = por %p3364_p10, %p3363_p9 }
  0x34   : > { %p3359_p8 = pneg %p3358_p5 }
  0x35   : > { %3196 = dma.hbm_to_vmem [thread:$0]  (!%p3746_p6), %s4369_s8, 2048, %s520_s22, [#allocation6], %s3593_s29, %s3593_s29, %s3594_s1  }
  0x36   : > { %p3366_p12 = pnand %p3365_p11, %p3359_p8 }
  0x38   : > { %3369 = shalt.err (!%p3366_p12)
}
  0x39   : > { %s4370_s10 = sld [smem:[#allocation34_spill]]  ;;  %s3381_s24 = scalar_lea.vmem %s3752_s27, 2048 }
  0x3a   : > { %p3382_p13 = scmp.ne.s32.totalorder %s3752_s27, %s3381_s24  ;;  %p3389_p5 = scmp.lt.s32.totalorder %s3752_s27, %s3752_s27 }
  0x3b   : > { %p3390_p8 = scmp.lt.s32.totalorder %s3381_s24, %s3381_s24 }
  0x3c   : > { %p3384_p0 = pnand %p3382_p13, %p3320_p7 }
  0x3d   : > { %p3391_p9 = por %p3390_p8, %p3389_p5 }
  0x3e   : > { %p3385_p2 = pneg %p3384_p0 }
  0x3f   : > { %3199 = dma.hbm_to_vmem [thread:$0]  (!%p3746_p6), %s4370_s10, 2048, %s3750_s25, [#allocation9], %s3593_s29, %s3593_s29, %s3594_s1  }
  0x40   : > { %p3392_p10 = pnand %p3391_p9, %p3385_p2 }
  0x42   : > { %3395 = shalt.err (!%p3392_p10)
}
  0x43   : > { %s4371_s12 = sld [smem:[#allocation35_spill]]  ;;  %s3595_s26 = smov [#allocation11]  }
  0x44   : > { %s567_s28 = sshll.u32 %s3595_s26, 4  ;;  %s568_s28 = int_to_ptr.vmem [resolvable:$true] %s567_s28 }
  0x45   : > { %s3407_s22 = scalar_lea.vmem %s568_s28, 2048  ;;  %p3415_p0 = scmp.lt.s32.totalorder %s568_s28, %s568_s28 }
  0x46   : > { %p3408_p11 = scmp.ne.s32.totalorder %s568_s28, %s3407_s22  ;;  %p3416_p2 = scmp.lt.s32.totalorder %s3407_s22, %s3407_s22 }
  0x48   : > { %p3410_p12 = pnand %p3408_p11, %p3320_p7  ;;  %p3417_p5 = por %p3416_p2, %p3415_p0 }
  0x49   : > { %3202 = dma.hbm_to_vmem [thread:$0]  (!%p3746_p6), %s4371_s12, 2048, %s3752_s27, [#allocation9], %s3593_s29, %s3593_s29, %s3594_s1  }
  0x4a   : > { %p3411_p13 = pneg %p3410_p12 }
  0x4c   : > { %p3418_p8 = pnand %p3417_p5, %p3411_p13 }
  0x4e   : > { %3421 = shalt.err (!%p3418_p8)
}
  0x4f   : > { %s4372_s14 = sld [smem:[#allocation36_spill]]  ;;  %s2778_s3 = sadd.s32 4294967294, %s3588_s21  }
  0x50   : > { %s3812_s18 = sadd.s32 1, %s3588_s21   ;;  %s51_s26 = sadd.s32 1, %s3584_s20 }
  0x51   : > { %4373 = sst [smem:[#allocation25_spill]] %s3812_s18  ;;  %s48_s25 = ssub.s32 %s3588_s21, %s3812_s18 }
  0x52   : > { %p49_p7 = scmp.eq.s32.totalorder %s48_s25, 0  ;;  %p58_p9 = scmp.ne.s32.totalorder %s3584_s20, %s3580_s30 }
  0x53   : > { %p59_p10 = scmp.eq.s32.totalorder %s3588_s21, 0  ;;  %p64_p11 = scmp.ne.s32.totalorder %s3580_s30, %s3576_s0 }
  0x54   : > { %s3823_s22 = scalar_select %p49_p7, %s3584_s20, %s51_s26  }
  0x55   : > { %3205 = dma.hbm_to_vmem [thread:$0]  (!%p3746_p6), %s4372_s14, 2048, %s568_s28, [#allocation12], %s3593_s29, %s3593_s29, %s3594_s1  }
  0x56   : > { %4374 = sst [smem:[#allocation26_spill]] %s3823_s22  ;;  %p3825_p12 = por %p59_p10, %p58_p9 }
  0x57   : > { %p3831_p6 = por %p4348_p1, %p64_p11  ;;  %p450_p13 = scmp.eq.s32.totalorder %s3732_s2, 1 }
  0x58   : > { %p456_p0 = scmp.eq.s32.totalorder %s2778_s3, 1  ;;  %p3224_p2 = scmp.lt.s32.totalorder %s3588_s21, 2 }
  0x59   : > { %s4376_s29 = scalar_select %p3831_p6, 1, 0 }
  0x5a   : > { %s590_s1 = sand.u32 1, %s3584_s20   ;;  %p3838_p5 = por %p450_p13, %p58_p9 }
  0x5b   : > { %p3842_p8 = por %p456_p0, %p64_p11  ;;  %s3846_s25 = sshll.u32 %s590_s1, 3 }
  0x5c   : > { %s4377_s28 = scalar_select %p3838_p5, 1, 0 }
  0x5d   : > { %s4379_s24 = scalar_select %p3842_p8, 1, 0 }
  0x5e   : > { %4378 = sst [smem:[#allocation27_spill]] %s4377_s28  ;;  %s2786_s26 = sshll.u32 %s3588_s21, 7 }
  0x5f   : > { %4380 = sst [smem:[#allocation28_spill]] %s4379_s24  ;;  %s594_s3 = scalar_lea.vmem [#allocation2], %s3846_s25 }
  0x60   : > { %s4381_s12 = sld [smem:[#allocation29_spill]]  ;;  %s601_s22 = sshll.u32 %s594_s3, 4  ;;  %s3855_s22 = int_to_ptr.vmem [resolvable:$true] %s601_s22 }
  0x61   : > { %p3859_p7 = pnand %p3224_p2, %p3825_p12  ;;  %s4383_s0 = sld [smem:[#allocation30_spill]] }
  0x62   : > { %s608_s10 = sand.u32 1, %s3588_s21   ;;  %s591_s16 = scalar_lea.sflag [#allocation3], %s590_s1 }
  0x63   : > { %p3424_p10 = pneg %p3859_p7 }
  0x66   : > { %s3852_s14 = scalar_lea.hbm %s4381_s12, %s2786_s26  ;;  %s3427_s28 = scalar_lea.hbm %s4381_s12, 256 }
  0x67   : > { %s4384_s17 = smov %s4383_s0  ;;  %s3866_s8 = scalar_lea.hbm %s4383_s0, %s2786_s26 }
  0x68   : > { %s3422_s19 = scalar_lea.hbm %s3852_s14, 128  ;;  %p3428_p13 = scmp.lt.s32.totalorder %s3852_s14, %s4381_s12 }
  0x69   : > { %p3423_p9 = scmp.ne.s32.totalorder %s3852_s14, %s3422_s19  ;;  %p3429_p0 = scmp.lt.s32.totalorder %s3427_s28, %s3422_s19 }
  0x6b   : > { %p3425_p11 = pnand %p3424_p10, %p3423_p9  ;;  %p3430_p2 = por %p3429_p0, %p3428_p13 }
  0x6d   : > { %p3426_p12 = pneg %p3425_p11 }
  0x6f   : > { %p3431_p4 = pnand %p3430_p2, %p3426_p12 }
  0x71   : > { %3434 = shalt.err (!%p3431_p4)
}
  0x72   : > { %s3435_s0 = scalar_lea.vmem %s3855_s22, 128  ;;  %s3596_s1 = smov [#allocation2]  }
  0x73   : > { %p3436_p1 = scmp.ne.s32.totalorder %s3855_s22, %s3435_s0  ;;  %s3440_s24 = sshll.u32 %s3596_s1, 4  ;;  %s3441_s24 = int_to_ptr.vmem [resolvable:$false] %s3440_s24 }
  0x74   : > { %s3442_s26 = scalar_lea.vmem %s3441_s24, 256  ;;  %p3443_p8 = scmp.lt.s32.totalorder %s3855_s22, %s3441_s24 }
  0x75   : > { %p3438_p9 = pnand %p3436_p1, %p3424_p10  ;;  %p3444_p5 = scmp.lt.s32.totalorder %s3442_s26, %s3435_s0 }
  0x77   : > { %p3439_p11 = pneg %p3438_p9  ;;  %p3445_p6 = por %p3444_p5, %p3443_p8 }
  0x79   : > { %p3446_p13 = pnand %p3445_p6, %p3439_p11 }
  0x7b   : > { %3449 = shalt.err (!%p3446_p13)
}
  0x7c   : > { %3209 = dma.hbm_to_vmem [thread:$0]  (!%p3859_p7), %s3852_s14, 128, %s3855_s22, %s591_s16  }
  0x7d   : > { %s612_s15 = scalar_lea.vmem [#allocation5], %s3846_s25  ;;  %s609_s28 = scalar_lea.sflag [#allocation6], %s608_s10 }
  0x7e   : > { %s619_s19 = sshll.u32 %s612_s15, 4  ;;  %s3450_s27 = scalar_lea.hbm %s3866_s8, 128  ;;  %s620_s19 = int_to_ptr.vmem [resolvable:$true] %s619_s19 }
  0x7f   : > { %p3451_p1 = scmp.ne.s32.totalorder %s3866_s8, %s3450_s27  ;;  %s3455_s0 = scalar_lea.hbm %s4384_s17, 256 }
  0x80   : > { %p3456_p5 = scmp.lt.s32.totalorder %s3866_s8, %s4384_s17  ;;  %p3457_p8 = scmp.lt.s32.totalorder %s3455_s0, %s3450_s27 }
  0x81   : > { %p3453_p4 = pnand %p3451_p1, %p3424_p10 }
  0x82   : > { %p3458_p12 = por %p3457_p8, %p3456_p5 }
  0x83   : > { %p3454_p6 = pneg %p3453_p4 }
  0x85   : > { %p3459_p0 = pnand %p3458_p12, %p3454_p6 }
  0x87   : > { %3462 = shalt.err (!%p3459_p0)
}
  0x88   : > { %s3463_s14 = scalar_lea.vmem %s620_s19, 128  ;;  %s3597_s16 = smov [#allocation5]  }
  0x89   : > { %p3464_p2 = scmp.ne.s32.totalorder %s620_s19, %s3463_s14  ;;  %s3468_s22 = sshll.u32 %s3597_s16, 4  ;;  %s3469_s22 = int_to_ptr.vmem [resolvable:$false] %s3468_s22 }
  0x8a   : > { %s3470_s25 = scalar_lea.vmem %s3469_s22, 256  ;;  %p3471_p13 = scmp.lt.s32.totalorder %s620_s19, %s3469_s22 }
  0x8b   : > { %p3466_p9 = pnand %p3464_p2, %p3424_p10  ;;  %p3472_p1 = scmp.lt.s32.totalorder %s3470_s25, %s3463_s14 }
  0x8d   : > { %p3467_p11 = pneg %p3466_p9  ;;  %p3473_p4 = por %p3472_p1, %p3471_p13 }
  0x8f   : > { %p3474_p3 = pnand %p3473_p4, %p3467_p11 }
  0x91   : > { %3477 = shalt.err (!%p3474_p3)
}
  0x92   : > { %3212 = dma.hbm_to_vmem [thread:$0]  (!%p3859_p7), %s3866_s8, 128, %s620_s19, %s609_s28  }
  0x93   : > { %p4385_p6 = scmp.ne.s32.totalorder %s4367_s23, 0 }
  0x94   : > { %s3917_s10 = sand.u32 (!%p4385_p6), 1, %s3580_s30   ;;  %p4386_p10 = scmp.ne.s32.totalorder (!%p4385_p6), %s4376_s29, 0 }
  0x95   : > { %628 = sbr.rel (%p4385_p6) target bundleno = 5582 (0x15ce), region = 92  ;;  %s3920_s26 = sshll.u32 (!%p4385_p6), %s3917_s10, 3 }
  0x96   : > { %s631_s15 = scalar_lea.sflag (!%p4385_p6), [#allocation3], %s3917_s10  ;;  %s634_s27 = scalar_lea.vmem (!%p4385_p6), [#allocation2], %s3920_s26 }
  0x9a   : > { %3547 = dma.done.wait (%p4386_p10), %s631_s15, 128  }
  0x9b   : > { %3549 = vsyncadd (%p4386_p10), %s631_s15, 4294967168  ;;  %s639_s20 = sand.u32 1, %s3732_s2   ;;  %s643_s8 = scalar_lea.vmem [#allocation5], %s3920_s26 }
  0x9c   : > { %s640_s23 = scalar_lea.sflag [#allocation6], %s639_s20 }
  0x9d   : > { %3551 = dma.done.wait (%p4386_p10), %s640_s23, 128  }
  0x9e   : > { %3553 = vsyncadd (%p4386_p10), %s640_s23, 4294967168  ;;  %p4387_p3 = scmp.eq.s32.totalorder %s3732_s2, 0 }
  0xa0   : > { %3555 = dma.done.wait (%p4387_p3), [#allocation6], 2048   ;;  %p4388_p7 = pmov %p4387_p3 }
  0xa1   : > { %p4389_p5 = pmov %p4387_p3 }
  0xa2   : > { %3557 = vsyncadd (%p4388_p7), [#allocation6], 4294965248 }
  0xa3   : > { %3559 = dma.done.wait (%p4389_p5), [#allocation9], 4096   ;;  %p4390_p8 = pmov %p4387_p3 }
  0xa4   : > { %p4391_p12 = pmov %p4387_p3 }
  0xa5   : > { %3561 = vsyncadd (%p4390_p8), [#allocation9], 4294963200 }
  0xa6   : > { %3563 = dma.done.wait (%p4391_p12), [#allocation12], 2048   ;;  %p4392_p0 = pmov %p4387_p3 }
  0xa7   : > { %v725_v0 = vld [vmem:[%s643_s8] sm:$0xff]  ;;  %v724_v1 = vld [vmem:[%s634_s27] sm:$0xff]  ;;  %v3598_v4 = vmov 0.0   ;;  %vm3599_vm0 = vmmov 0   ;;  %s4393_s1 = sld [smem:[#allocation31_spill]]  ;;  %vm1076_vm1 = vcmask 130048  }
  0xa8   : > { %3565 = vsyncadd (%p4392_p0), [#allocation12], 4294965248  ;;  %756 = vadd.xlane.f32.xlu0 %v725_v0  ;;  %v905_v2 = vld [vmem:[#allocation8 + $0x78] sm:$0xff]  ;;  %2984 = vmatprep.subr.mxu1 %v3598_v4  ;;  %v904_v5 = vld [vmem:[#allocation8 + $0x70] sm:$0xff]  ;;  %s4394_s16 = sld [smem:[#allocation32_spill]]  ;;  %vm1154_vm2 = vcmask 64512  }
  0xa9   : > { %v812_v3 = vld [vmem:[#allocation7 + $0x78] sm:$0xff]  ;;  %2949 = vmatprep.subr.mxu0 %v3598_v4  ;;  %v811_v6 = vld [vmem:[#allocation7 + $0x70] sm:$0xff]  ;;  %2985 = vmatpush3.msra.mxu1 %v905_v2  ;;  %v903_v7 = vld [vmem:[#allocation8 + $0x68] sm:$0xff]  ;;  %s3600_s18 = smov 112   ;;  %s2797_s0 = sshll.u32 %s3917_s10, 6  ;;  %vm2446_vm3 = vcmask 261120  }
  0xaa   : > { %2950 = vmatpush3.msra.mxu0 %v812_v3  ;;  %2986 = vmatprep.subr.mxu1 %v3598_v4  ;;  %v902_v8 = vld [vmem:[#allocation8 + $0x60] sm:$0xff]  ;;  %v810_v17 = vld [vmem:[#allocation7 + $0x68] sm:$0xff]  ;;  %v901_v18 = vld [vmem:[#allocation8 + $0x58] sm:$0xff]  ;;  %s3601_s24 = smov 96   ;;  %s3602_s14 = smov 80   ;;  %vm2448_vm4 = vcmask 392192  }
  0xab   : > { %2951 = vmatprep.subr.mxu0 %v3598_v4  ;;  %2987 = vmatpush3.msra.mxu1 %v904_v5  ;;  %v809_v19 = vld [vmem:[#allocation7 + $0x60] sm:$0xff]  ;;  %v900_v20 = vld [vmem:[#allocation8 + $0x50] sm:$0xff]  ;;  %v808_v21 = vld [vmem:[#allocation7 + $0x58] sm:$0xff]  ;;  %s3604_s22 = smov 48   ;;  %s3605_s25 = smov 32   ;;  %vm2450_vm5 = vcmask 523264  }
  0xac   : > { %728 = vadd.xlane.f32.xlu0 %v724_v1  ;;  %2952 = vmatpush3.msra.mxu0 %v811_v6  ;;  %v899_v22 = vld [vmem:[#allocation8 + $0x48] sm:$0xff]  ;;  %v807_v23 = vld [vmem:[#allocation7 + $0x50] sm:$0xff]  ;;  %v898_v24 = vld [vmem:[#allocation8 + $0x40] sm:$0xff]  ;;  %s3606_s15 = smov 16   ;;  %vm2452_vm6 = vcmask 654336   ;;  %vm2454_vm7 = vcmask 785408  }
  0xad   : > { %2988 = vmatprep.subr.mxu1 %v3598_v4  ;;  %2953 = vmatprep.subr.mxu0 %v3598_v4  ;;  %v806_v25 = vld [vmem:[#allocation7 + $0x48] sm:$0xff]  ;;  %v897_v26 = vld [vmem:[#allocation8 + $0x38] sm:$0xff]  ;;  %v805_v27 = vld [vmem:[#allocation7 + $0x40] sm:$0xff]  ;;  %vm2456_vm8 = vcmask 916480   ;;  %s4395_s8 = sld [smem:[#allocation37_spill]]  ;;  %s2848_s19 = sshll.u32 %s3732_s2, 10 }
  0xae   : > { %2989 = vmatpush3.msra.mxu1 %v903_v7  ;;  %2954 = vmatpush3.msra.mxu0 %v810_v17  ;;  %v896_v28 = vld [vmem:[#allocation8 + $0x30] sm:$0xff]  ;;  %v804_v29 = vld [vmem:[#allocation7 + $0x38] sm:$0xff]  ;;  %v895_v30 = vld [vmem:[#allocation8 + $0x28] sm:$0xff]  ;;  %s4396_s29 = sld [smem:[#allocation27_spill]] }
  0xaf   : > { %2990 = vmatprep.subr.mxu1 %v3598_v4  ;;  %2955 = vmatprep.subr.mxu0 %v3598_v4  ;;  %v803_v31 = vld [vmem:[#allocation7 + $0x30] sm:$0xff]  ;;  %v894_v32 = vld [vmem:[#allocation8 + $0x20] sm:$0xff]  ;;  %v802_v33 = vld [vmem:[#allocation7 + $0x28] sm:$0xff] }
  0xb0   : > { %2991 = vmatpush3.msra.mxu1 %v902_v8  ;;  %2956 = vmatpush3.msra.mxu0 %v809_v19  ;;  %v893_v34 = vld [vmem:[#allocation8 + $0x18] sm:$0xff]  ;;  %v801_v35 = vld [vmem:[#allocation7 + $0x20] sm:$0xff]  ;;  %v892_v36 = vld [vmem:[#allocation8 + $0x10] sm:$0xff] }
  0xb1   : > { %2992 = vmatprep.subr.mxu1 %v3598_v4  ;;  %2957 = vmatprep.subr.mxu0 %v3598_v4  ;;  %v800_v37 = vld [vmem:[#allocation7 + $0x18] sm:$0xff]  ;;  %v891_v38 = vld [vmem:[#allocation8 + $0x8] sm:$0xff]  ;;  %v799_v39 = vld [vmem:[#allocation7 + $0x10] sm:$0xff] }
  0xb2   : > { %2993 = vmatpush3.msra.mxu1 %v901_v18  ;;  %2958 = vmatpush3.msra.mxu0 %v808_v21  ;;  %v890_v40 = vld [vmem:[#allocation8] sm:$0xff]  ;;  %v798_v41 = vld [vmem:[#allocation7 + $0x8] sm:$0xff]  ;;  %v998_v61 = vld [vmem:[#allocation10 + $0x78] sm:$0xff] }
  0xb3   : > { %2994 = vmatprep.subr.mxu1 %v3598_v4  ;;  %2959 = vmatprep.subr.mxu0 %v3598_v4  ;;  %v797_v42 = vld [vmem:[#allocation7] sm:$0xff]  ;;  %v997_v62 = vld [vmem:[#allocation10 + $0x70] sm:$0xff]  ;;  %v996_v63 = vld [vmem:[#allocation10 + $0x68] sm:$0xff] }
  0xb4   : > { %2995 = vmatpush3.msra.mxu1 %v900_v20  ;;  %2960 = vmatpush3.msra.mxu0 %v807_v23  ;;  %v2800_v50 = vld [vmem:[%s4321_s4] ss:$0 sm:$0xff]  ;;  %v993_v2 = vld [vmem:[#allocation10 + $0x50] sm:$0xff]  ;;  %v992_v3 = vld [vmem:[#allocation10 + $0x48] sm:$0xff]  ;;  %p4399_p9 = scmp.ne.s32.totalorder %s4396_s29, 0 }
  0xb5   : > { %2996 = vmatprep.subr.mxu1 %v3598_v4  ;;  %2961 = vmatprep.subr.mxu0 %v3598_v4  ;;  %v2801_v52 = vld [vmem:[%s4322_s5] ss:$0 sm:$0xff]  ;;  %v990_v6 = vld [vmem:[#allocation10 + $0x38] sm:$0xff]  ;;  %v989_v7 = vld [vmem:[#allocation10 + $0x30] sm:$0xff] }
  0xb6   : > { %2997 = vmatpush3.msra.mxu1 %v899_v22  ;;  %2962 = vmatpush3.msra.mxu0 %v806_v25  ;;  %v2798_v55 = vld [vmem:[%s4393_s1] ss:$0 sm:$0xff]  ;;  %v988_v8 = vld [vmem:[#allocation10 + $0x28] sm:$0xff]  ;;  %s4067_s1 = scalar_lea.vmem [#allocation14], %s2797_s0  ;;  %s4397_s0 = sld [smem:[#allocation41_spill]] }
  0xb7   : > { %2998 = vmatprep.subr.mxu1 %v3598_v4  ;;  %2963 = vmatprep.subr.mxu0 %v3598_v4  ;;  %v2799_v58 = vld [vmem:[%s4394_s16] ss:$0 sm:$0xff]  ;;  %s3603_s16 = smov 64   ;;  %s2612_s28 = sshll.u32 %s4067_s1, 4  ;;  %s4250_s28 = int_to_ptr.vmem [resolvable:$true] %s2612_s28 }
  0xb8   : > { %2999 = vmatpush3.msra.mxu1 %v898_v24  ;;  %2964 = vmatpush3.msra.mxu0 %v805_v27  ;;  %v991_v5 = vld [vmem:[#allocation10 + $0x40] sm:$0xff] }
  0xb9   : > { %3000 = vmatprep.subr.mxu1 %v3598_v4  ;;  %2965 = vmatprep.subr.mxu0 %v3598_v4  ;;  %v2805_v18 = vld [vmem:[%s4328_s11] ss:$0 sm:$0xff] }
  0xba   : > { %3001 = vmatpush3.msra.mxu1 %v897_v26  ;;  %2966 = vmatpush3.msra.mxu0 %v804_v29  ;;  %v2804_v22 = vld [vmem:[%s4326_s9] ss:$0 sm:$0xff] }
  0xbb   : > { %3002 = vmatprep.subr.mxu1 %v3598_v4  ;;  %2967 = vmatprep.subr.mxu0 %v3598_v4  ;;  %v2806_v26 = vld [vmem:[%s4330_s13] ss:$0 sm:$0xff] }
  0xbc   : > { %3003 = vmatpush3.msra.mxu1 %v896_v28  ;;  %2968 = vmatpush3.msra.mxu0 %v803_v31 }
  0xbd   : > { %3004 = vmatprep.subr.mxu1 %v3598_v4  ;;  %2969 = vmatprep.subr.mxu0 %v3598_v4 }
  0xbe   : > { %3005 = vmatpush3.msra.mxu1 %v895_v30  ;;  %2970 = vmatpush3.msra.mxu0 %v802_v33 }
  0xbf   : > { %3006 = vmatprep.subr.mxu1 %v3598_v4  ;;  %2971 = vmatprep.subr.mxu0 %v3598_v4 }
  0xc0   : > { %3007 = vmatpush3.msra.mxu1 %v894_v32  ;;  %2972 = vmatpush3.msra.mxu0 %v801_v35 }
  0xc1   : > { %3008 = vmatprep.subr.mxu1 %v3598_v4  ;;  %2973 = vmatprep.subr.mxu0 %v3598_v4 }
  0xc2   : > { %3009 = vmatpush3.msra.mxu1 %v893_v34  ;;  %2974 = vmatpush3.msra.mxu0 %v800_v37 }
  0xc3   : > { %3010 = vmatprep.subr.mxu1 %v3598_v4  ;;  %2975 = vmatprep.subr.mxu0 %v3598_v4 }
  0xc4   : > { %3011 = vmatpush3.msra.mxu1 %v892_v36  ;;  %2976 = vmatpush3.msra.mxu0 %v799_v39 }
  0xc5   : > { %3012 = vmatprep.subr.mxu1 %v3598_v4  ;;  %2977 = vmatprep.subr.mxu0 %v3598_v4 }
  0xc6   : > { %3013 = vmatpush3.msra.mxu1 %v891_v38  ;;  %3016 = vmatprep.mubr.msk.f32.mxu1 %vm3599_vm0, %v3598_v4 }
  0xc7   : > { %3014 = vmatprep.subr.mxu1 %v3598_v4  ;;  %2978 = vmatpush3.msra.mxu0 %v798_v41 }
  0xc8   : > { %3015 = vmatpush3.msra.mxu1 %v890_v40  ;;  %2979 = vmatprep.subr.mxu0 %v3598_v4 }
  0xc9   : > { %2981 = vmatprep.mubr.msk.f32.mxu0 %vm3599_vm0, %v3598_v4  ;;  %2980 = vmatpush3.msra.mxu0 %v797_v42 }
  0xca   : > { %3054 = vmatprep.subr.mxu1 %v3598_v4  ;;  %3019 = vmatprep.subr.mxu0 %v3598_v4 }
 0x131   : > { %v757_v9 = vpop.xlane.xlu0 %756 }
 0x132   : > { %v758_v10 = vmul.f32 0.0078125, %v757_v9  ;;  %v987_v9 = vld [vmem:[#allocation10 + $0x20] sm:$0xff] }
 0x134   : > { %v3956_v11 = vsub.f32 %v725_v0, %v758_v10  ;;  %v995_v0 = vld [vmem:[#allocation10 + $0x60] sm:$0xff]  ;;  %v986_v10 = vld [vmem:[#allocation10 + $0x18] sm:$0xff] }
 0x135   : > { %v729_v12 = vpop.xlane.xlu0 %728 }
 0x136   : > { %v731_v13 = vmul.f32 0.0078125, %v729_v12  ;;  %v760_v14 = vmul.f32 %v3956_v11, %v3956_v11  ;;  %v985_v12 = vld [vmem:[#allocation10 + $0x10] sm:$0xff] }
 0x138   : > { %v3960_v15 = vsub.f32 %v724_v1, %v731_v13  ;;  %761 = vadd.xlane.f32.xlu1 %v760_v14  ;;  %v994_v1 = vld [vmem:[#allocation10 + $0x58] sm:$0xff]  ;;  %v984_v13 = vld [vmem:[#allocation10 + $0x8] sm:$0xff] }
 0x13a   : > { %v733_v16 = vmul.f32 %v3960_v15, %v3960_v15 }
 0x13c   : > { %734 = vadd.xlane.f32.xlu1 %v733_v16  ;;  %v983_v16 = vld [vmem:[#allocation10] sm:$0xff] }
 0x1c1   : > { %v762_v43 = vpop.xlane.xlu1 %761 }
 0x1c2   : > { %v763_v44 = vmul.f32 0.0078125, %v762_v43 }
 0x1c4   : > { %v764_v45 = vadd.f32 1e-05, %v763_v44 }
 0x1c5   : > { %v735_v46 = vpop.xlane.xlu1 %734 }
 0x1c6   : > { %3279 = vrsqrt.f32 %v764_v45  ;;  %v736_v47 = vmul.f32 0.0078125, %v735_v46 }
 0x1c8   : > { %v737_v48 = vadd.f32 1e-05, %v736_v47 }
 0x1ca   : > { %3281 = vrsqrt.f32 %v737_v48 }
 0x1d3   : > { %v3280_v49 = vpop.eup %3279 }
 0x1d4   : > { %v766_v51 = vmul.f32 %v3280_v49, %v3956_v11  ;;  %v2802_v11 = vld [vmem:[%s4323_s6] ss:$0 sm:$0xff] }
 0x1d6   : > { %v773_v53 = vmul.f32 %v2800_v50, %v766_v51  ;;  %v789_v14 = vmul.f32 %v2802_v11, %v766_v51 }
 0x1d7   : > { %v3282_v54 = vpop.eup %3281 }
 0x1d8   : > { %v780_v56 = vadd.f32 %v2801_v52, %v773_v53  ;;  %v739_v57 = vmul.f32 %v3282_v54, %v3960_v15  ;;  %v2803_v15 = vld [vmem:[%s4324_s7] ss:$0 sm:$0xff] }
 0x1d9   : > { %v796_v17 = vadd.f32 %v2803_v15, %v789_v14 }
 0x1da   : > { %3017 = vmatmul.mubr.f32.vlgmr.msra.gmra.mxu1 %v780_v56  ;;  %v746_v59 = vmul.f32 %v2798_v55, %v739_v57 }
 0x1db   : > { %3056 = vmatprep.mubr.msk.f32.mxu1 %vm3599_vm0, %v3598_v4 }
 0x1dc   : > { %v753_v60 = vadd.f32 %v2799_v58, %v746_v59 }
 0x1de   : > { %2982 = vmatmul.mubr.f32.vlgmr.msra.gmra.mxu0 %v753_v60 }
 0x1df   : > { %3020 = vmatpush3.msra.mxu0 %v998_v61  ;;  %3051 = vmatprep.mubr.msk.f32.mxu0 %vm3599_vm0, %v3598_v4 }
 0x1e0   : > { %3021 = vmatprep.subr.mxu0 %v3598_v4 }
 0x1e1   : > { %3022 = vmatpush3.msra.mxu0 %v997_v62 }
 0x1e2   : > { %3023 = vmatprep.subr.mxu0 %v3598_v4 }
 0x1e3   : > { %3024 = vmatpush3.msra.mxu0 %v996_v63 }
 0x1e4   : > { %3025 = vmatprep.subr.mxu0 %v3598_v4 }
 0x1e5   : > { %3026 = vmatpush3.msra.mxu0 %v995_v0 }
 0x1e6   : > { %3027 = vmatprep.subr.mxu0 %v3598_v4 }
 0x1e7   : > { %3028 = vmatpush3.msra.mxu0 %v994_v1 }
 0x1e8   : > { %3029 = vmatprep.subr.mxu0 %v3598_v4 }
 0x1e9   : > { %3030 = vmatpush3.msra.mxu0 %v993_v2 }
 0x1ea   : > { %3031 = vmatprep.subr.mxu0 %v3598_v4 }
 0x1eb   : > { %3032 = vmatpush3.msra.mxu0 %v992_v3 }
 0x1ec   : > { %3033 = vmatprep.subr.mxu0 %v3598_v4 }
 0x1ed   : > { %3034 = vmatpush3.msra.mxu0 %v991_v5 }
 0x1ee   : > { %3035 = vmatprep.subr.mxu0 %v3598_v4 }
 0x1ef   : > { %3036 = vmatpush3.msra.mxu0 %v990_v6 }
 0x1f0   : > { %3037 = vmatprep.subr.mxu0 %v3598_v4 }
 0x1f1   : > { %3038 = vmatpush3.msra.mxu0 %v989_v7 }
 0x1f2   : > { %3039 = vmatprep.subr.mxu0 %v3598_v4 }
 0x1f3   : > { %3040 = vmatpush3.msra.mxu0 %v988_v8 }
 0x1f4   : > { %3041 = vmatprep.subr.mxu0 %v3598_v4 }
 0x1f5   : > { %3042 = vmatpush3.msra.mxu0 %v987_v9 }
 0x1f6   : > { %3043 = vmatprep.subr.mxu0 %v3598_v4 }
 0x1f7   : > { %3044 = vmatpush3.msra.mxu0 %v986_v10 }
 0x1f8   : > { %3045 = vmatprep.subr.mxu0 %v3598_v4 }
 0x1f9   : > { %3046 = vmatpush3.msra.mxu0 %v985_v12 }
 0x1fa   : > { %3047 = vmatprep.subr.mxu0 %v3598_v4 }
 0x1fb   : > { %3048 = vmatpush3.msra.mxu0 %v984_v13 }
 0x1fc   : > { %3049 = vmatprep.subr.mxu0 %v3598_v4 }
 0x1fd   : > { %3050 = vmatpush3.msra.mxu0 %v983_v16 }
 0x1fe   : > { %3052 = vmatmul.mubr.f32.vlgmr.msra.gmra.mxu0 %v796_v17  ;;  %3134 = vmatprep.subr.mxu0 %v3598_v4 }
 0x1ff   : > { %3166 = vmatprep.mubr.msk.f32.mxu0 %vm3599_vm0, %v3598_v4 }
 0x29a   : > { %v979_v19 = vpop.f32.mrf.mxu1 }
 0x29b   : > { %v4039_v20 = vadd.f32 %v2805_v18, %v979_v19 }
 0x29c   : > { %v3018_v21 = vpop.f32.mrf.mxu1 }
 0x29d   : > { %3055 = vmatpush3.xpose.msk.msra.mxu1 %vm1076_vm1, %v4039_v20 }
 0x29e   : > { %v886_v23 = vpop.f32.mrf.mxu0  ;;  %3059 = vmatprep.subr.mxu1 %v3598_v4 }
 0x29f   : > { %v4047_v24 = vadd.f32 %v2804_v22, %v886_v23 }
 0x2a0   : > { %v2983_v25 = vpop.f32.mrf.mxu0 }
 0x2a1   : > { %3057 = vmatmul.mubr.msk.f32.vlgmr.msra.gmra.mxu1 %vm1076_vm1, %v4047_v24 }
 0x2a2   : > { %3061 = vmatprep.mubr.msk.f32.mxu1 %vm3599_vm0, %v3598_v4 }
 0x2be   : > { %v1072_v27 = vpop.f32.mrf.mxu0 }
 0x2bf   : > { %v4056_v28 = vadd.f32 %v2806_v26, %v1072_v27 }
 0x2c0   : > { %v3053_v29 = vpop.f32.mrf.mxu0 }
 0x2c1   : > { %3060 = vmatpush3.msra.mxu1 %v4056_v28 }
 0x2c2   : > { %3064 = vmatprep.subr.mxu1 %v3598_v4 }
 0x361   : > { %v1149_v30 = vpop.f32.mrf.mxu1 }
 0x362   : > { %v1153_v31 = vmul.f32 0.25, %v1149_v30 }
 0x363   : > { %v3058_v32 = vpop.f32.mrf.mxu1 }
 0x364   : > { %v1155_v33 = vsel %vm1154_vm2, %v1153_v31, -inf }
 0x365   : > { %1156 = vmax.xlane.f32.xlu0 %v1155_v33 }
 0x37b   : > { %1242 = vrot.lane.b32.xlu0 %v4039_v20, %s3600_s18 }
 0x3ee   : > { %v1157_v34 = vpop.xlane.xlu0 %1156 }
 0x3ef   : > { %v1158_v35 = vsub.f32 %v1153_v31, %v1157_v34 }
 0x3f1   : > { %v1159_v36 = vmul.f32 1.442695, %v1158_v35 }
 0x3f2   : > { %v1243_v42 = vpop.permute.xlu0 %1242 }
 0x3f3   : > { %3283 = vpow2.f32 %v1159_v36 }
 0x400   : > { %v3284_v37 = vpop.eup %3283 }
 0x401   : > { %v1161_v38 = vsel %vm1154_vm2, %v3284_v37, 0.0 }
 0x402   : > { %1162 = vadd.xlane.f32.xlu1 %v1161_v38 }
 0x413   : > { %1240 = vrot.lane.b32.xlu1 %v4047_v24, %s3600_s18 }
 0x48b   : > { %v1163_v39 = vpop.xlane.xlu1 %1162 }
 0x48c   : > { %3285 = vrcp.f32 %v1163_v39 }
 0x48f   : > { %v1241_v43 = vpop.permute.xlu1 %1240 }
 0x499   : > { %v3286_v40 = vpop.eup %3285 }
 0x49a   : > { %v1165_v41 = vmul.f32 %v3286_v40, %v3284_v37 }
 0x49c   : > { %1166 = vst.msk [vmem:[%s4067_s1] sm:$0xff] %vm1154_vm2, %v1165_v41  ;;  %3062 = vmatmul.mubr.msk.f32.vlgmr.msra.gmra.mxu1 %vm1154_vm2, %v1165_v41 }
 0x49d   : > { %3065 = vmatpush3.xpose.msk.msra.mxu1 %vm1076_vm1, %v1243_v42  ;;  %3066 = vmatprep.mubr.msk.f32.mxu1 %vm3599_vm0, %v3598_v4 }
 0x49e   : > { %3069 = vmatprep.subr.mxu1 %v3598_v4 }
 0x4a0   : > { %3067 = vmatmul.mubr.msk.f32.vlgmr.msra.gmra.mxu1 %vm1076_vm1, %v1241_v43 }
 0x4a1   : > { %3071 = vmatprep.mubr.msk.f32.mxu1 %vm3599_vm0, %v3598_v4 }
 0x55c   : > { %v4079_v44 = vpop.f32.mrf.mxu1 }
 0x55e   : > { %v3063_v45 = vpop.f32.mrf.mxu1 }
 0x560   : > { %v1314_v46 = vpop.f32.mrf.mxu1 }
 0x561   : > { %v1318_v47 = vmul.f32 0.25, %v1314_v46 }
 0x562   : > { %v3068_v48 = vpop.f32.mrf.mxu1 }
 0x563   : > { %v1319_v49 = vsel %vm1154_vm2, %v1318_v47, -inf }
 0x564   : > { %1320 = vmax.xlane.f32.xlu1 %v1319_v49 }
 0x575   : > { %1411 = vrot.lane.b32.xlu1 %v4039_v20, %s3601_s24 }
 0x579   : > { %1409 = vrot.lane.b32.xlu1 %v4047_v24, %s3601_s24 }
 0x5ed   : > { %v1321_v50 = vpop.xlane.xlu1 %1320 }
 0x5ee   : > { %v1322_v51 = vsub.f32 %v1318_v47, %v1321_v50 }
 0x5f0   : > { %v1323_v52 = vmul.f32 1.442695, %v1322_v51 }
 0x5f1   : > { %v1412_v58 = vpop.permute.xlu1 %1411 }
 0x5f2   : > { %3287 = vpow2.f32 %v1323_v52 }
 0x5f5   : > { %v1410_v60 = vpop.permute.xlu1 %1409 }
 0x5ff   : > { %v3288_v53 = vpop.eup %3287 }
 0x600   : > { %v1325_v54 = vsel %vm1154_vm2, %v3288_v53, 0.0 }
 0x601   : > { %1326 = vadd.xlane.f32.xlu0 %v1325_v54 }
 0x617   : > { %1333 = vrot.lane.b32.xlu0 %v4056_v28, %s3600_s18 }
 0x68a   : > { %v1327_v55 = vpop.xlane.xlu0 %1326 }
 0x68b   : > { %3289 = vrcp.f32 %v1327_v55 }
 0x68e   : > { %v1334_v56 = vpop.permute.xlu0 %1333 }
 0x68f   : > { %3070 = vmatpush3.msra.mxu1 %v1334_v56 }
 0x690   : > { %3074 = vmatprep.subr.mxu1 %v3598_v4 }
 0x698   : > { %v3290_v57 = vpop.eup %3289 }
 0x699   : > { %v1329_v59 = vmul.f32 %v3290_v57, %v3288_v53 }
 0x69b   : > { %2812 = vst.msk [vmem:[%s4067_s1 + $0x8] sm:$0xff] %vm1154_vm2, %v1329_v59  ;;  %3072 = vmatmul.mubr.msk.f32.vlgmr.msra.gmra.mxu1 %vm1154_vm2, %v1329_v59 }
 0x69c   : > { %3075 = vmatpush3.xpose.msk.msra.mxu1 %vm1076_vm1, %v1412_v58  ;;  %3076 = vmatprep.mubr.msk.f32.mxu1 %vm3599_vm0, %v3598_v4 }
 0x69d   : > { %3079 = vmatprep.subr.mxu1 %v3598_v4 }
 0x69f   : > { %3077 = vmatmul.mubr.msk.f32.vlgmr.msra.gmra.mxu1 %vm1076_vm1, %v1410_v60 }
 0x6a0   : > { %3081 = vmatprep.mubr.msk.f32.mxu1 %vm3599_vm0, %v3598_v4 }
 0x75b   : > { %v4100_v61 = vpop.f32.mrf.mxu1 }
 0x75d   : > { %v3073_v62 = vpop.f32.mrf.mxu1 }
 0x75f   : > { %v1483_v63 = vpop.f32.mrf.mxu1 }
 0x760   : > { %v1487_v0 = vmul.f32 0.25, %v1483_v63 }
 0x761   : > { %v3078_v1 = vpop.f32.mrf.mxu1 }
 0x762   : > { %v1488_v2 = vsel %vm1154_vm2, %v1487_v0, -inf }
 0x763   : > { %1489 = vmax.xlane.f32.xlu1 %v1488_v2 }
 0x774   : > { %1579 = vrot.lane.b32.xlu1 %v4039_v20, %s3602_s14 }
 0x778   : > { %1577 = vrot.lane.b32.xlu1 %v4047_v24, %s3602_s14 }
 0x7ec   : > { %v1490_v3 = vpop.xlane.xlu1 %1489 }
 0x7ed   : > { %v1491_v5 = vsub.f32 %v1487_v0, %v1490_v3 }
 0x7ef   : > { %v1492_v6 = vmul.f32 1.442695, %v1491_v5 }
 0x7f0   : > { %v1580_v12 = vpop.permute.xlu1 %1579 }
 0x7f1   : > { %3291 = vpow2.f32 %v1492_v6 }
 0x7f4   : > { %v1578_v14 = vpop.permute.xlu1 %1577 }
 0x7fe   : > { %v3292_v7 = vpop.eup %3291 }
 0x7ff   : > { %v1494_v8 = vsel %vm1154_vm2, %v3292_v7, 0.0 }
 0x800   : > { %1495 = vadd.xlane.f32.xlu0 %v1494_v8 }
 0x816   : > { %1501 = vrot.lane.b32.xlu0 %v4056_v28, %s3601_s24 }
 0x889   : > { %v1496_v9 = vpop.xlane.xlu0 %1495 }
 0x88a   : > { %3293 = vrcp.f32 %v1496_v9 }
 0x88d   : > { %v1502_v10 = vpop.permute.xlu0 %1501 }
 0x88e   : > { %3080 = vmatpush3.msra.mxu1 %v1502_v10 }
 0x88f   : > { %3084 = vmatprep.subr.mxu1 %v3598_v4 }
 0x897   : > { %v3294_v11 = vpop.eup %3293 }
 0x898   : > { %v1498_v13 = vmul.f32 %v3294_v11, %v3292_v7 }
 0x89a   : > { %2816 = vst.msk [vmem:[%s4067_s1 + $0x10] sm:$0xff] %vm1154_vm2, %v1498_v13  ;;  %3082 = vmatmul.mubr.msk.f32.vlgmr.msra.gmra.mxu1 %vm1154_vm2, %v1498_v13 }
 0x89b   : > { %3085 = vmatpush3.xpose.msk.msra.mxu1 %vm1076_vm1, %v1580_v12  ;;  %3086 = vmatprep.mubr.msk.f32.mxu1 %vm3599_vm0, %v3598_v4 }
 0x89c   : > { %3089 = vmatprep.subr.mxu1 %v3598_v4 }
 0x89e   : > { %3087 = vmatmul.mubr.msk.f32.vlgmr.msra.gmra.mxu1 %vm1076_vm1, %v1578_v14 }
 0x89f   : > { %3091 = vmatprep.mubr.msk.f32.mxu1 %vm3599_vm0, %v3598_v4 }
 0x95a   : > { %v4121_v15 = vpop.f32.mrf.mxu1 }
 0x95c   : > { %v3083_v16 = vpop.f32.mrf.mxu1 }
 0x95e   : > { %v1651_v17 = vpop.f32.mrf.mxu1 }
 0x95f   : > { %v1655_v18 = vmul.f32 0.25, %v1651_v17 }
 0x960   : > { %v3088_v19 = vpop.f32.mrf.mxu1 }
 0x961   : > { %v1656_v21 = vsel %vm1154_vm2, %v1655_v18, -inf }
 0x962   : > { %1657 = vmax.xlane.f32.xlu0 %v1656_v21 }
 0x978   : > { %1669 = vrot.lane.b32.xlu0 %v4056_v28, %s3602_s14 }
 0x97c   : > { %1745 = vrot.lane.b32.xlu0 %v4047_v24, %s3603_s16 }
 0x9eb   : > { %v1658_v22 = vpop.xlane.xlu0 %1657 }
 0x9ec   : > { %v1659_v23 = vsub.f32 %v1655_v18, %v1658_v22 }
 0x9ee   : > { %v1660_v25 = vmul.f32 1.442695, %v1659_v23 }
 0x9ef   : > { %v1670_v26 = vpop.permute.xlu0 %1669 }
 0x9f0   : > { %3295 = vpow2.f32 %v1660_v25  ;;  %3090 = vmatpush3.msra.mxu1 %v1670_v26 }
 0x9f1   : > { %3094 = vmatprep.subr.mxu1 %v3598_v4 }
 0x9f3   : > { %v1746_v34 = vpop.permute.xlu0 %1745 }
 0x9fd   : > { %v3296_v27 = vpop.eup %3295 }
 0x9fe   : > { %v1662_v29 = vsel %vm1154_vm2, %v3296_v27, 0.0 }
 0x9ff   : > { %1663 = vadd.xlane.f32.xlu1 %v1662_v29 }
 0xa10   : > { %1747 = vrot.lane.b32.xlu1 %v4039_v20, %s3603_s16 }
 0xa88   : > { %v1664_v30 = vpop.xlane.xlu1 %1663 }
 0xa89   : > { %3297 = vrcp.f32 %v1664_v30 }
 0xa8c   : > { %v1748_v33 = vpop.permute.xlu1 %1747 }
 0xa96   : > { %v3298_v31 = vpop.eup %3297 }
 0xa97   : > { %v1666_v32 = vmul.f32 %v3298_v31, %v3296_v27 }
 0xa99   : > { %2820 = vst.msk [vmem:[%s4067_s1 + $0x18] sm:$0xff] %vm1154_vm2, %v1666_v32  ;;  %3092 = vmatmul.mubr.msk.f32.vlgmr.msra.gmra.mxu1 %vm1154_vm2, %v1666_v32 }
 0xa9a   : > { %3095 = vmatpush3.xpose.msk.msra.mxu1 %vm1076_vm1, %v1748_v33  ;;  %3096 = vmatprep.mubr.msk.f32.mxu1 %vm3599_vm0, %v3598_v4 }
 0xa9b   : > { %3099 = vmatprep.subr.mxu1 %v3598_v4 }
 0xa9d   : > { %3097 = vmatmul.mubr.msk.f32.vlgmr.msra.gmra.mxu1 %vm1076_vm1, %v1746_v34 }
 0xa9e   : > { %3101 = vmatprep.mubr.msk.f32.mxu1 %vm3599_vm0, %v3598_v4 }
 0xb59   : > { %v4142_v35 = vpop.f32.mrf.mxu1 }
 0xb5b   : > { %v3093_v36 = vpop.f32.mrf.mxu1 }
 0xb5d   : > { %v1819_v37 = vpop.f32.mrf.mxu1 }
 0xb5e   : > { %v1823_v38 = vmul.f32 0.25, %v1819_v37 }
 0xb5f   : > { %v3098_v39 = vpop.f32.mrf.mxu1 }
 0xb60   : > { %v1824_v40 = vsel %vm1154_vm2, %v1823_v38, -inf }
 0xb61   : > { %1825 = vmax.xlane.f32.xlu1 %v1824_v40 }
 0xb72   : > { %1915 = vrot.lane.b32.xlu1 %v4039_v20, %s3604_s22 }
 0xb76   : > { %1913 = vrot.lane.b32.xlu1 %v4047_v24, %s3604_s22 }
 0xbea   : > { %v1826_v41 = vpop.xlane.xlu1 %1825 }
 0xbeb   : > { %v1827_v42 = vsub.f32 %v1823_v38, %v1826_v41  ;;  %v2473_v41 = vld [vmem:[#allocation11 + $0x78] sm:$0xff] }
 0xbec   : > { %3135 = vmatpush3.msra.mxu0 %v2473_v41 }
 0xbed   : > { %v1828_v43 = vmul.f32 1.442695, %v1827_v42  ;;  %v2472_v42 = vld [vmem:[#allocation11 + $0x70] sm:$0xff]  ;;  %3136 = vmatprep.subr.mxu0 %v3598_v4 }
 0xbee   : > { %v1916_v50 = vpop.permute.xlu1 %1915  ;;  %3137 = vmatpush3.msra.mxu0 %v2472_v42 }
 0xbef   : > { %3299 = vpow2.f32 %v1828_v43  ;;  %v2471_v43 = vld [vmem:[#allocation11 + $0x68] sm:$0xff]  ;;  %3138 = vmatprep.subr.mxu0 %v3598_v4 }
 0xbf0   : > { %3139 = vmatpush3.msra.mxu0 %v2471_v43 }
 0xbf1   : > { %3140 = vmatprep.subr.mxu0 %v3598_v4 }
 0xbf2   : > { %v1914_v52 = vpop.permute.xlu1 %1913 }
 0xbfc   : > { %v3300_v45 = vpop.eup %3299 }
 0xbfd   : > { %v1830_v46 = vsel %vm1154_vm2, %v3300_v45, 0.0 }
 0xbfe   : > { %1831 = vadd.xlane.f32.xlu0 %v1830_v46  ;;  %v2467_v46 = vld [vmem:[#allocation11 + $0x48] sm:$0xff] }
 0xc14   : > { %1837 = vrot.lane.b32.xlu0 %v4056_v28, %s3603_s16 }
 0xc87   : > { %v1832_v47 = vpop.xlane.xlu0 %1831 }
 0xc88   : > { %3301 = vrcp.f32 %v1832_v47  ;;  %v2466_v47 = vld [vmem:[#allocation11 + $0x40] sm:$0xff] }
 0xc8b   : > { %v1838_v48 = vpop.permute.xlu0 %1837 }
 0xc8c   : > { %3100 = vmatpush3.msra.mxu1 %v1838_v48  ;;  %v2465_v48 = vld [vmem:[#allocation11 + $0x38] sm:$0xff] }
 0xc8d   : > { %3104 = vmatprep.subr.mxu1 %v3598_v4 }
 0xc95   : > { %v3302_v49 = vpop.eup %3301 }
 0xc96   : > { %v1834_v51 = vmul.f32 %v3302_v49, %v3300_v45  ;;  %v2468_v45 = vld [vmem:[#allocation11 + $0x50] sm:$0xff] }
 0xc97   : > { %v2464_v49 = vld [vmem:[#allocation11 + $0x30] sm:$0xff] }
 0xc98   : > { %2824 = vst.msk [vmem:[%s4067_s1 + $0x20] sm:$0xff] %vm1154_vm2, %v1834_v51  ;;  %3102 = vmatmul.mubr.msk.f32.vlgmr.msra.gmra.mxu1 %vm1154_vm2, %v1834_v51  ;;  %v2462_v51 = vld [vmem:[#allocation11 + $0x20] sm:$0xff] }
 0xc99   : > { %3105 = vmatpush3.xpose.msk.msra.mxu1 %vm1076_vm1, %v1916_v50  ;;  %3106 = vmatprep.mubr.msk.f32.mxu1 %vm3599_vm0, %v3598_v4  ;;  %v2463_v50 = vld [vmem:[#allocation11 + $0x28] sm:$0xff] }
 0xc9a   : > { %3109 = vmatprep.subr.mxu1 %v3598_v4 }
 0xc9c   : > { %3107 = vmatmul.mubr.msk.f32.vlgmr.msra.gmra.mxu1 %vm1076_vm1, %v1914_v52  ;;  %v2461_v52 = vld [vmem:[#allocation11 + $0x18] sm:$0xff] }
 0xc9d   : > { %3111 = vmatprep.mubr.msk.f32.mxu1 %vm3599_vm0, %v3598_v4 }
 0xd58   : > { %v4163_v53 = vpop.f32.mrf.mxu1 }
 0xd5a   : > { %v3103_v54 = vpop.f32.mrf.mxu1 }
 0xd5b   : > { %v2459_v54 = vld [vmem:[#allocation11 + $0x8] sm:$0xff] }
 0xd5c   : > { %v1987_v55 = vpop.f32.mrf.mxu1 }
 0xd5d   : > { %v1991_v56 = vmul.f32 0.25, %v1987_v55  ;;  %v2458_v55 = vld [vmem:[#allocation11] sm:$0xff] }
 0xd5e   : > { %v3108_v57 = vpop.f32.mrf.mxu1 }
 0xd5f   : > { %v1992_v58 = vsel %vm1154_vm2, %v1991_v56, -inf }
 0xd60   : > { %1993 = vmax.xlane.f32.xlu0 %v1992_v58 }
 0xd76   : > { %2005 = vrot.lane.b32.xlu0 %v4056_v28, %s3604_s22 }
 0xd7a   : > { %2081 = vrot.lane.b32.xlu0 %v4047_v24, %s3605_s25 }
 0xde9   : > { %v1994_v59 = vpop.xlane.xlu0 %1993 }
 0xdea   : > { %v1995_v60 = vsub.f32 %v1991_v56, %v1994_v59 }
 0xdec   : > { %v1996_v62 = vmul.f32 1.442695, %v1995_v60 }
 0xded   : > { %v2006_v63 = vpop.permute.xlu0 %2005 }
 0xdee   : > { %3303 = vpow2.f32 %v1996_v62  ;;  %3110 = vmatpush3.msra.mxu1 %v2006_v63 }
 0xdef   : > { %3114 = vmatprep.subr.mxu1 %v3598_v4 }
 0xdf1   : > { %v2082_v7 = vpop.permute.xlu0 %2081 }
 0xdfb   : > { %v3304_v0 = vpop.eup %3303 }
 0xdfc   : > { %v1998_v1 = vsel %vm1154_vm2, %v3304_v0, 0.0 }
 0xdfd   : > { %1999 = vadd.xlane.f32.xlu1 %v1998_v1 }
 0xe0e   : > { %2083 = vrot.lane.b32.xlu1 %v4039_v20, %s3605_s25 }
 0xe86   : > { %v2000_v2 = vpop.xlane.xlu1 %1999 }
 0xe87   : > { %3305 = vrcp.f32 %v2000_v2 }
 0xe8a   : > { %v2084_v6 = vpop.permute.xlu1 %2083 }
 0xe94   : > { %v3306_v3 = vpop.eup %3305 }
 0xe95   : > { %v2002_v5 = vmul.f32 %v3306_v3, %v3304_v0 }
 0xe97   : > { %2828 = vst.msk [vmem:[%s4067_s1 + $0x28] sm:$0xff] %vm1154_vm2, %v2002_v5  ;;  %3112 = vmatmul.mubr.msk.f32.vlgmr.msra.gmra.mxu1 %vm1154_vm2, %v2002_v5 }
 0xe98   : > { %3115 = vmatpush3.xpose.msk.msra.mxu1 %vm1076_vm1, %v2084_v6  ;;  %3116 = vmatprep.mubr.msk.f32.mxu1 %vm3599_vm0, %v3598_v4 }
 0xe99   : > { %3119 = vmatprep.subr.mxu1 %v3598_v4 }
 0xe9b   : > { %3117 = vmatmul.mubr.msk.f32.vlgmr.msra.gmra.mxu1 %vm1076_vm1, %v2082_v7 }
 0xe9c   : > { %3121 = vmatprep.mubr.msk.f32.mxu1 %vm3599_vm0, %v3598_v4 }
 0xf57   : > { %v2077_v8 = vpop.f32.mrf.mxu1 }
 0xf59   : > { %v3113_v9 = vpop.f32.mrf.mxu1 }
 0xf5b   : > { %v2155_v10 = vpop.f32.mrf.mxu1 }
 0xf5c   : > { %v2159_v11 = vmul.f32 0.25, %v2155_v10 }
 0xf5d   : > { %v3118_v12 = vpop.f32.mrf.mxu1 }
 0xf5e   : > { %v2160_v13 = vsel %vm1154_vm2, %v2159_v11, -inf  ;;  %v3317_v12 = vld [vmem:[%s634_s27] sm:$0xff]  ;;  %s2586_s27 = scalar_lea.sflag [#allocation15], %s3917_s10 }
 0xf5f   : > { %2161 = vmax.xlane.f32.xlu1 %v2160_v13 }
 0xf70   : > { %2251 = vrot.lane.b32.xlu1 %v4039_v20, %s3606_s15 }
 0xf74   : > { %2249 = vrot.lane.b32.xlu1 %v4047_v24, %s3606_s15 }
 0xfe8   : > { %v2162_v14 = vpop.xlane.xlu1 %2161 }
 0xfe9   : > { %v2163_v16 = vsub.f32 %v2159_v11, %v2162_v14 }
 0xfeb   : > { %v2164_v17 = vmul.f32 1.442695, %v2163_v16 }
 0xfec   : > { %v2252_v24 = vpop.permute.xlu1 %2251 }
 0xfed   : > { %3307 = vpow2.f32 %v2164_v17 }
 0xff0   : > { %v2250_v25 = vpop.permute.xlu1 %2249 }
 0xffa   : > { %v3308_v18 = vpop.eup %3307 }
 0xffb   : > { %v2166_v19 = vsel %vm1154_vm2, %v3308_v18, 0.0 }
 0xffc   : > { %2167 = vadd.xlane.f32.xlu0 %v2166_v19 }
0x1012   : > { %2173 = vrot.lane.b32.xlu0 %v4056_v28, %s3605_s25 }
0x1085   : > { %v2168_v21 = vpop.xlane.xlu0 %2167 }
0x1086   : > { %3309 = vrcp.f32 %v2168_v21 }
0x1089   : > { %v2174_v22 = vpop.permute.xlu0 %2173 }
0x108a   : > { %3120 = vmatpush3.msra.mxu1 %v2174_v22 }
0x108b   : > { %3124 = vmatprep.subr.mxu1 %v3598_v4 }
0x1093   : > { %v3310_v20 = vpop.eup %3309 }
0x1094   : > { %v2170_v23 = vmul.f32 %v3310_v20, %v3308_v18 }
0x1096   : > { %2832 = vst.msk [vmem:[%s4067_s1 + $0x30] sm:$0xff] %vm1154_vm2, %v2170_v23  ;;  %3122 = vmatmul.mubr.msk.f32.vlgmr.msra.gmra.mxu1 %vm1154_vm2, %v2170_v23 }
0x1097   : > { %3125 = vmatpush3.xpose.msk.msra.mxu1 %vm1076_vm1, %v2252_v24  ;;  %3126 = vmatprep.mubr.msk.f32.mxu1 %vm3599_vm0, %v3598_v4 }
0x1098   : > { %3129 = vmatprep.subr.mxu1 %v3598_v4 }
0x109a   : > { %3127 = vmatmul.mubr.msk.f32.vlgmr.msra.gmra.mxu1 %vm1076_vm1, %v2250_v25 }
0x109b   : > { %3131 = vmatprep.mubr.msk.f32.mxu1 %vm3599_vm0, %v3598_v4 }
0x1156   : > { %v2245_v26 = vpop.f32.mrf.mxu1 }
0x1158   : > { %v3123_v27 = vpop.f32.mrf.mxu1 }
0x115a   : > { %v2323_v29 = vpop.f32.mrf.mxu1 }
0x115b   : > { %v2327_v30 = vmul.f32 0.25, %v2323_v29 }
0x115c   : > { %v3128_v31 = vpop.f32.mrf.mxu1 }
0x115d   : > { %v2328_v32 = vsel %vm1154_vm2, %v2327_v30, -inf }
0x115e   : > { %2329 = vmax.xlane.f32.xlu0 %v2328_v32 }
0x1174   : > { %2341 = vrot.lane.b32.xlu0 %v4056_v28, %s3606_s15 }
0x1178   : > { %2422 = vrot.lane.b32.xlu0 %v4121_v15, %s3605_s25 }
0x117c   : > { %2430 = vrot.lane.b32.xlu0 %v4163_v53, %s3603_s16  ;;  %v2460_v53 = vld [vmem:[#allocation11 + $0x10] sm:$0xff]  ;;  %s3478_s16 = scalar_lea.vmem %s4250_s28, 1024 }
0x117d   : > { %p3479_p2 = scmp.ne.s32.totalorder %s4250_s28, %s3478_s16 }
0x117f   : > { %p3480_p11 = pnand %p3479_p2, %p4399_p9 }
0x1180   : > { %2438 = vrot.lane.b32.xlu0 %v2245_v26, %s3601_s24  ;;  %s4398_s24 = smov %s4397_s0 }
0x1181   : > { %p3481_p13 = pneg %p3480_p11 }
0x11e7   : > { %v2330_v33 = vpop.xlane.xlu0 %2329 }
0x11e8   : > { %v2331_v34 = vsub.f32 %v2327_v30, %v2330_v33 }
0x11ea   : > { %v2332_v36 = vmul.f32 1.442695, %v2331_v34 }
0x11eb   : > { %v2342_v37 = vpop.permute.xlu0 %2341 }
0x11ec   : > { %3311 = vpow2.f32 %v2332_v36  ;;  %3130 = vmatpush3.msra.mxu1 %v2342_v37 }
0x11ef   : > { %v2423_v59 = vpop.permute.xlu0 %2422 }
0x11f3   : > { %v2431_v0 = vpop.permute.xlu0 %2430 }
0x11f7   : > { %v2439_v5 = vpop.permute.xlu0 %2438 }
0x11f9   : > { %v3312_v38 = vpop.eup %3311 }
0x11fa   : > { %v2334_v39 = vsel %vm1154_vm2, %v3312_v38, 0.0 }
0x11fb   : > { %2335 = vadd.xlane.f32.xlu1 %v2334_v39 }
0x120c   : > { %2418 = vrot.lane.b32.xlu1 %v4100_v61, %s3606_s15  ;;  %v2470_v61 = vld [vmem:[#allocation11 + $0x60] sm:$0xff] }
0x120d   : > { %3141 = vmatpush3.msra.mxu0 %v2470_v61 }
0x120e   : > { %3142 = vmatprep.subr.mxu0 %v3598_v4 }
0x1210   : > { %2426 = vrot.lane.b32.xlu1 %v4142_v35, %s3604_s22  ;;  %v2469_v35 = vld [vmem:[#allocation11 + $0x58] sm:$0xff]  ;;  %s3607_s22 = smov [#allocation14]  }
0x1211   : > { %3143 = vmatpush3.msra.mxu0 %v2469_v35  ;;  %s3482_s25 = sshll.u32 %s3607_s22, 4  ;;  %s3483_s25 = int_to_ptr.vmem [resolvable:$false] %s3482_s25 }
0x1212   : > { %3144 = vmatprep.subr.mxu0 %v3598_v4  ;;  %p3485_p1 = scmp.lt.s32.totalorder %s4250_s28, %s3483_s25 }
0x1213   : > { %3145 = vmatpush3.msra.mxu0 %v2468_v45 }
0x1214   : > { %2434 = vrot.lane.b32.xlu1 %v2077_v8, %s3602_s14  ;;  %3146 = vmatprep.subr.mxu0 %v3598_v4  ;;  %s4248_s14 = scalar_lea.hbm %s4397_s0, %s2848_s19 }
0x1215   : > { %3147 = vmatpush3.msra.mxu0 %v2467_v46 }
0x1216   : > { %3148 = vmatprep.subr.mxu0 %v3598_v4 }
0x1217   : > { %3149 = vmatpush3.msra.mxu0 %v2466_v47 }
0x1218   : > { %3150 = vmatprep.subr.mxu0 %v3598_v4 }
0x1219   : > { %3151 = vmatpush3.msra.mxu0 %v2465_v48 }
0x121a   : > { %3152 = vmatprep.subr.mxu0 %v3598_v4 }
0x121b   : > { %3153 = vmatpush3.msra.mxu0 %v2464_v49 }
0x121c   : > { %3154 = vmatprep.subr.mxu0 %v3598_v4 }
0x121d   : > { %3155 = vmatpush3.msra.mxu0 %v2463_v50 }
0x121e   : > { %3156 = vmatprep.subr.mxu0 %v3598_v4 }
0x121f   : > { %3157 = vmatpush3.msra.mxu0 %v2462_v51 }
0x1220   : > { %3158 = vmatprep.subr.mxu0 %v3598_v4 }
0x1221   : > { %3159 = vmatpush3.msra.mxu0 %v2461_v52 }
0x1222   : > { %3160 = vmatprep.subr.mxu0 %v3598_v4 }
0x1223   : > { %3161 = vmatpush3.msra.mxu0 %v2460_v53 }
0x1224   : > { %3162 = vmatprep.subr.mxu0 %v3598_v4 }
0x1225   : > { %3163 = vmatpush3.msra.mxu0 %v2459_v54 }
0x1226   : > { %3164 = vmatprep.subr.mxu0 %v3598_v4 }
0x1227   : > { %3165 = vmatpush3.msra.mxu0 %v2458_v55 }
0x1284   : > { %v2336_v28 = vpop.xlane.xlu1 %2335 }
0x1285   : > { %3313 = vrcp.f32 %v2336_v28 }
0x1288   : > { %v2419_v58 = vpop.permute.xlu1 %2418 }
0x1289   : > { %v2445_v62 = vsel %vm1076_vm1, %v4079_v44, %v2419_v58  ;;  %v2838_v44 = vld [vmem:[%s4395_s8] ss:$0 sm:$0xff] }
0x128a   : > { %v2447_v63 = vsel %vm2446_vm3, %v2445_v62, %v2423_v59 }
0x128c   : > { %v2427_v60 = vpop.permute.xlu1 %2426 }
0x128d   : > { %v2449_v1 = vsel %vm2448_vm4, %v2447_v63, %v2427_v60 }
0x128e   : > { %v2451_v2 = vsel %vm2450_vm5, %v2449_v1, %v2431_v0 }
0x1290   : > { %v2435_v4 = vpop.permute.xlu1 %2434 }
0x1291   : > { %v2453_v3 = vsel %vm2452_vm6, %v2451_v2, %v2435_v4 }
0x1292   : > { %v3314_v15 = vpop.eup %3313  ;;  %v2455_v6 = vsel %vm2454_vm7, %v2453_v3, %v2439_v5 }
0x1293   : > { %v2338_v40 = vmul.f32 %v3314_v15, %v3312_v38 }
0x1295   : > { %2836 = vst.msk [vmem:[%s4067_s1 + $0x38] sm:$0xff] %vm1154_vm2, %v2338_v40  ;;  %3132 = vmatmul.mubr.msk.f32.vlgmr.msra.gmra.mxu1 %vm1154_vm2, %v2338_v40  ;;  %s3484_s1 = scalar_lea.vmem %s3483_s25, 2048 }
0x1296   : > { %p3486_p4 = scmp.lt.s32.totalorder %s3484_s1, %s3478_s16 }
0x1298   : > { %p3487_p6 = por %p3486_p4, %p3485_p1 }
0x129a   : > { %p3488_p10 = pnand %p3487_p6, %p3481_p13 }
0x1355   : > { %v2413_v56 = vpop.f32.mrf.mxu1 }
0x1356   : > { %2442 = vrot.lane.b32.xlu1 %v2413_v56, %s3600_s18 }
0x1357   : > { %v3133_v57 = vpop.f32.mrf.mxu1 }
0x13c8   : > { %v2443_v7 = vpop.permute.xlu1 %2442 }
0x13c9   : > { %v2457_v8 = vsel %vm2456_vm8, %v2455_v6, %v2443_v7 }
0x13ca   : > { %3167 = vmatmul.mubr.f32.vlgmr.msra.gmra.mxu0 %v2457_v8 }
0x148a   : > { %v2547_v9 = vpop.f32.mrf.mxu0 }
0x148b   : > { %v2548_v10 = vadd.f32 %v2838_v44, %v2547_v9 }
0x148c   : > { %v3168_v11 = vpop.f32.mrf.mxu0 }
0x148d   : > { %v2551_v13 = vadd.f32 %v3317_v12, %v2548_v10 }
0x148f   : > { %2554 = vadd.xlane.f32.xlu0 %v2551_v13 }
0x1518   : > { %v2555_v14 = vpop.xlane.xlu0 %2554 }
0x1519   : > { %v2556_v16 = vmul.f32 0.0078125, %v2555_v14 }
0x151b   : > { %v2557_v17 = vsub.f32 %v2551_v13, %v2556_v16 }
0x151d   : > { %v2558_v18 = vmul.f32 %v2557_v17, %v2557_v17 }
0x151f   : > { %2559 = vadd.xlane.f32.xlu1 %v2558_v18 }
0x1520   : > { %3491 = shalt.err (!%p3488_p10)
}
0x1521   : > { %s3492_s15 = scalar_lea.hbm %s4248_s14, 1024  ;;  %s3496_s8 = scalar_lea.hbm %s4398_s24, 2048 }
0x1522   : > { %p3493_p3 = scmp.ne.s32.totalorder %s4248_s14, %s3492_s15  ;;  %p3497_p8 = scmp.lt.s32.totalorder %s4248_s14, %s4398_s24 }
0x1523   : > { %p3498_p12 = scmp.lt.s32.totalorder %s3496_s8, %s3492_s15 }
0x1524   : > { %p3494_p7 = pnand %p3493_p3, %p4399_p9 }
0x1525   : > { %p3499_p0 = por %p3498_p12, %p3497_p8 }
0x1526   : > { %p3495_p5 = pneg %p3494_p7 }
0x1528   : > { %p3500_p2 = pnand %p3499_p0, %p3495_p5 }
0x152a   : > { %3503 = shalt.err (!%p3500_p2)
}
0x152b   : > { %s3608_s18 = smov 128   ;;  %s3609_s0 = smov 8  }
0x152c   : > { %3190 = dma.vmem_to_hbm [thread:$0]  (%p4399_p9), %s4250_s28, 1024, %s4248_s14, %s2586_s27, %s3608_s18, %s3608_s18, %s3609_s0  }
0x152d   : > { %s4400_s25 = sld [smem:[#allocation38_spill]]  ;;  %s2843_s23 = sshll.u32 %s3732_s2, 7 }
0x152e   : > { %s4401_s20 = sld [smem:[#allocation39_spill]]  ;;  %s716_s8 = scalar_lea.vmem [#allocation13], %s3920_s26 }
0x152f   : > { %s2599_s19 = sshll.u32 %s716_s8, 4  ;;  %s4402_s27 = sld [smem:[#allocation40_spill]]  ;;  %s2600_s19 = int_to_ptr.vmem [resolvable:$true] %s2599_s19 }
0x1530   : > { %s2581_s18 = scalar_lea.sflag [#allocation4], %s3917_s10  ;;  %s3504_s0 = scalar_lea.vmem %s2600_s19, 128 }
0x1531   : > { %p3505_p11 = scmp.ne.s32.totalorder %s2600_s19, %s3504_s0  ;;  %s3610_s16 = smov [#allocation13]  }
0x1532   : > { %s3508_s22 = sshll.u32 %s3610_s16, 4  ;;  %s3509_s22 = int_to_ptr.vmem [resolvable:$false] %s3508_s22 }
0x1533   : > { %v2839_v24 = vld [vmem:[%s4400_s25] ss:$0 sm:$0xff]  ;;  %p3506_p13 = pnand %p3505_p11, %p4399_p9  ;;  %s3510_s2 = scalar_lea.vmem %s3509_s22, 256 }
0x1534   : > { %v2840_v25 = vld [vmem:[%s4401_s20] ss:$0 sm:$0xff]  ;;  %p3511_p4 = scmp.lt.s32.totalorder %s2600_s19, %s3509_s22  ;;  %p3512_p6 = scmp.lt.s32.totalorder %s3510_s2, %s3504_s0 }
0x1535   : > { %s2597_s3 = scalar_lea.hbm %s4402_s27, %s2843_s23  ;;  %p3507_p1 = pneg %p3506_p13 }
0x1536   : > { %p3513_p10 = por %p3512_p6, %p3511_p4 }
0x1538   : > { %p3514_p3 = pnand %p3513_p10, %p3507_p1 }
0x15a8   : > { %v2560_v19 = vpop.xlane.xlu1 %2559 }
0x15a9   : > { %v2561_v21 = vmul.f32 0.0078125, %v2560_v19 }
0x15ab   : > { %v2562_v22 = vadd.f32 1e-05, %v2561_v21 }
0x15ad   : > { %3315 = vrsqrt.f32 %v2562_v22 }
0x15ba   : > { %v3316_v20 = vpop.eup %3315 }
0x15bb   : > { %v2564_v23 = vmul.f32 %v3316_v20, %v2557_v17 }
0x15bd   : > { %v2571_v26 = vmul.f32 %v2839_v24, %v2564_v23 }
0x15bf   : > { %v2578_v27 = vadd.f32 %v2840_v25, %v2571_v26 }
0x15c1   : > { %2579 = vst [vmem:[%s716_s8] sm:$0xff] %v2578_v27 }
0x15c2   : > { %3517 = shalt.err (!%p3514_p3)
}
0x15c3   : > { %s3518_s26 = scalar_lea.hbm %s2597_s3, 128  ;;  %s3522_s1 = scalar_lea.hbm %s4402_s27, 256 }
0x15c4   : > { %p3519_p7 = scmp.ne.s32.totalorder %s2597_s3, %s3518_s26  ;;  %p3523_p12 = scmp.lt.s32.totalorder %s2597_s3, %s4402_s27 }
0x15c5   : > { %p3524_p0 = scmp.lt.s32.totalorder %s3522_s1, %s3518_s26 }
0x15c6   : > { %p3520_p5 = pnand %p3519_p7, %p4399_p9 }
0x15c7   : > { %p3525_p2 = por %p3524_p0, %p3523_p12 }
0x15c8   : > { %p3521_p8 = pneg %p3520_p5 }
0x15ca   : > { %p3526_p11 = pnand %p3525_p2, %p3521_p8 }
0x15cc   : > { %3529 = shalt.err (!%p3526_p11)
}
0x15cd   : > { %3189 = dma.vmem_to_hbm [thread:$0]  (%p4399_p9), %s2600_s19, 128, %s2597_s3, %s2581_s18  }
0x15ce PF: > { %s4403_s23 = sld [smem:[#allocation23_spill]]  ;;  %p4406_p1 = scmp.ge.s32.totalorder %s3588_s21, 2 }
0x15cf   : > { %s4404_s8 = sld [smem:[#allocation28_spill]] }
0x15d4   : > { %s2627_s28 = sand.u32 1, %s4403_s23  }
0x15d5   : > { %p4405_p13 = scmp.ne.s32.totalorder %s4404_s8, 0  ;;  %s2628_s14 = scalar_lea.sflag [#allocation4], %s2627_s28 }
0x15d7   : > { %p3214_p4 = pnand %p4406_p1, %p4405_p13 }
0x15d9   : > { %p3215_p6 = pneg %p3214_p4 }
0x15db   : > { %3567 = dma.done.wait (%p3215_p6), %s2628_s14, 128  }
0x15dc   : > { %3569 = vsyncadd (%p3215_p6), %s2628_s14, 4294967168  ;;  %s2637_s0 = scalar_lea.sflag [#allocation15], %s2627_s28 }
0x15dd   : > { %3571 = dma.done.wait (%p3215_p6), %s2637_s0, 1024  }
0x15de   : > { %3573 = vsyncadd (%p3215_p6), %s2637_s0, 4294966272  ;;  %s4407_s21 = sld [smem:[#allocation25_spill]]  ;;  %s4410_s0 = smov %s3580_s30 }
0x15df   : > { %s4408_s16 = sld [smem:[#allocation24_spill]] }
0x15e0   : > { %s4409_s20 = sld [smem:[#allocation26_spill]] }
0x15e4   : > { %p41_p9 = scmp.ge.s32.totalorder %s4407_s21, 4  }
0x15e5   : > { %s4411_s30 = smov %s4408_s16 }
0x15e6   :  { %43 = sbr.rel (!%p41_p9) target bundleno = 25 (0x19), region = 190 }
0x15eb   :  { %2642 = vsyncpa [#allocation3], 1 }
0x15ec   :  { %2644 = vsyncpa [#allocation3 + $0x1], 1 }
0x15ed   :  { %2645 = vsyncpa [#allocation6], 1 }
0x15ee   :  { %2647 = vsyncpa [#allocation6 + $0x1], 1 }
0x15ef   :  { %2648 = vsyncpa [#allocation9], 1 }
0x15f0   :  { %2649 = vsyncpa [#allocation12], 1 }
0x15f1   :  { %2650 = vsyncpa [#allocation4], 1 }
0x15f2   :  { %2652 = vsyncpa [#allocation4 + $0x1], 1 }
0x15f3   :  { %2653 = vsyncpa [#allocation15], 1 }
0x15f4   :  { %2655 = vsyncpa [#allocation15 + $0x1], 1 }

</bundles_post_ra>
